<compile_context>
chip_gen: v7x
topology: tpu7x:2x2x1
jax: 0.10.0
libtpu: 0.0.40
codegen_flags: <defaults>
</compile_context>

<pallas_src>
import functools

import jax
import jax.numpy as jnp
from jax.experimental import pallas as pl
from jax.experimental.pallas import tpu as pltpu


def _round_up(a, b):
    return -(-a // b) * b


def _conv_kernel(x_ref, w_ref, b_ref, o_ref, *, K, Wp, n_lanes):
    """One (group, batch-tile) step of the grouped conv as a single im2col MXU dot.

    x_ref: (1, 1, Cg8, XB)       zero-padded image slab; NB samples folded into lanes (pitch P)
    w_ref: (1, Cog8, K*K*Cg8)    per-group weights, (kh, kw, cg)-ordered contraction axis
    b_ref: (1, Cog8, 1)          per-group bias (f32; pad rows are zero)
    o_ref: (1, 1, Cog8, n_lanes) dense stride-1 output slab (row pitch Wp, sample pitch P)
    """
    xf = x_ref[0, 0]                                   # (Cg8, XB)

    # K*K taps, each a single contiguous lane slice of the flattened slab.  Channel rows are
    # pre-padded to a multiple of 8 in the wrapper, so the concatenate lands exactly on
    # (8, 128) sublane-tile boundaries (no repacking).
    # TODO(synk): for large W, pad the row pitch to a multiple of 128 so the kh offsets become
    # lane-aligned and only K (not K*K) misaligned lane shifts remain.
    taps = []
    for kh in range(K):
        for kw in range(K):
            off = kh * Wp + kw
            taps.append(xf[:, off:off + n_lanes])
    patch = jnp.concatenate(taps, axis=0)              # (K*K*Cg8, n_lanes)

    # Single MXU dot per grid step, f32 accumulation; bias folded in before the store.
    acc = jnp.dot(w_ref[0], patch, preferred_element_type=jnp.float32)
    acc = acc + b_ref[0].astype(jnp.float32)
    o_ref[0, 0] = acc.astype(o_ref.dtype)


def large_kernel_conv(x, weight, bias, *, kernel_size, stride, groups,
                      compute_dtype=None, vmem_budget_bytes=32 * 1024 * 1024):
    """Grouped 2D conv, NCHW, padding=kernel_size//2, with bias (PyTorch Conv2d semantics)."""
    N, Cin, H, W = x.shape
    Cout = weight.shape[0]
    Cg = Cin // groups
    Cog = Cout // groups
    K = kernel_size
    pad = K // 2
    Hp, Wp = H + 2 * pad, W + 2 * pad
    P = Hp * Wp

    # Dense (stride-1) extents computed in-kernel; stride is applied by slicing the dense
    # result in the wrapper (simple, rarely-used fallback for stride > 1).
    OH1 = H + 2 * pad - K + 1
    OW1 = W + 2 * pad - K + 1
    OHs = (H + 2 * pad - K) // stride + 1
    OWs = (W + 2 * pad - K) // stride + 1

    Cg8 = _round_up(Cg, 8)
    Cog8 = _round_up(Cog, 8)
    maxoff = (K - 1) * (Wp + 1)          # largest tap offset (kh=kw=K-1)

    if compute_dtype is None:
        # Pass jnp.bfloat16 here on v6e/v7x for the native-MXU path (not bit-exact vs fp32).
        compute_dtype = x.dtype
    bpe = jnp.dtype(compute_dtype).itemsize

    # ---- choose the batch tile NB (samples folded into the lane axis of one dot) ----
    def _step_vmem(nb):
        nbl = _round_up(nb * P, 128)
        xb = _round_up(nbl + maxoff, 128)
        x_blk = Cg8 * xb * bpe
        patch = K * K * Cg8 * nbl * bpe
        out_blk = Cog8 * nbl * 4
        w_blk = Cog8 * K * K * Cg8 * bpe
        return 2 * x_blk + 2 * out_blk + 2 * patch + w_blk

    NB = 1
    for nb in range(min(N, 1024), 0, -1):
        if _step_vmem(nb) <= vmem_budget_bytes:
            NB = nb
            break
    if groups == 1 and N >= 2:
        # Keep >= 2 grid steps so both v7x TensorCores get work (no-op on v5e/v6e).
        NB = min(NB, -(-N // 2))
    NT = -(-N // NB)
    Npad = NT * NB

    NBL = _round_up(NB * P, 128)         # dot / output lane width (unmasked full-width stores)
    XB = _round_up(NBL + maxoff, 128)    # input slab lane width: every tap slice stays in-bounds

    # ---- layout glue (XLA side): halo-pad, group, pad channels to 8, fold batch into lanes ----
    # TODO(synk): the halo pad + relayout could instead be an in-kernel DMA into a zeroed VMEM
    # scratch to save one HBM round trip of x (matters most on v5e's lower HBM bandwidth).
    xg = x.reshape(N, groups, Cg, H, W)
    xg = jnp.pad(xg, ((0, Npad - N), (0, 0), (0, Cg8 - Cg), (pad, pad), (pad, pad)))
    xg = xg.transpose(1, 0, 2, 3, 4).reshape(groups, NT, NB, Cg8, P)
    xg = xg.transpose(0, 1, 3, 2, 4).reshape(groups, NT, Cg8, NB * P)
    xg = jnp.pad(xg, ((0, 0), (0, 0), (0, 0), (0, XB - NB * P)))
    xg = xg.astype(compute_dtype)

    # (Cout, Cg, K, K) -> (groups, Cog8, K*K*Cg8): contraction ordered (kh, kw, cg) to match the
    # im2col rows built in the kernel; zero padding makes pad rows contribute exactly zero.
    w_r = weight.reshape(groups, Cog, Cg, K, K)
    w_r = jnp.pad(w_r, ((0, 0), (0, Cog8 - Cog), (0, Cg8 - Cg), (0, 0), (0, 0)))
    w_r = w_r.transpose(0, 1, 3, 4, 2).reshape(groups, Cog8, K * K * Cg8).astype(compute_dtype)

    b_r = jnp.pad(bias.reshape(groups, Cog), ((0, 0), (0, Cog8 - Cog)))
    b_r = b_r.reshape(groups, Cog8, 1).astype(jnp.float32)

    kernel = functools.partial(_conv_kernel, K=K, Wp=Wp, n_lanes=NBL)

    out_dense = pl.pallas_call(
        kernel,
        out_shape=jax.ShapeDtypeStruct((groups, NT, Cog8, NBL), x.dtype),
        grid_spec=pltpu.PrefetchScalarGridSpec(
            num_scalar_prefetch=0,
            # groups is the OUTER grid axis so the per-group weight/bias blocks (index depends
            # only on g) stay resident in VMEM across all inner batch-tile steps.
            grid=(groups, NT),
            in_specs=[
                pl.BlockSpec((1, 1, Cg8, XB), lambda g, t: (g, t, 0, 0)),
                pl.BlockSpec((1, Cog8, K * K * Cg8), lambda g, t: (g, 0, 0)),
                pl.BlockSpec((1, Cog8, 1), lambda g, t: (g, 0, 0)),
            ],
            out_specs=pl.BlockSpec((1, 1, Cog8, NBL), lambda g, t: (g, t, 0, 0)),
        ),
        compiler_params=pltpu.CompilerParams(
            dimension_semantics=("parallel", "parallel"),
            vmem_limit_bytes=48 * 1024 * 1024,
        ),
    )(xg, w_r, b_r)

    # ---- un-flatten / crop (XLA side, pure slices: no pads, no extra HBM round trips) ----
    out = out_dense[:, :, :Cog, :NB * P]
    out = out.reshape(groups, NT, Cog, NB, Hp, Wp)[:, :, :, :, :OH1, :OW1]
    if stride > 1:
        out = out[:, :, :, :, ::stride, ::stride]
    out = out.transpose(1, 3, 0, 2, 4, 5).reshape(Npad, Cout, OHs, OWs)[:N]
    return out


if __name__ == "__main__":
    # Module config (small, consistent with LargeKernelConv.__init__)
    in_channels, out_channels = 4, 4
    kernel_size, stride, groups = 5, 1, 2

    key = jax.random.PRNGKey(0)
    kx, kw, kb = jax.random.split(key, 3)

    # Deterministic synthetic parameters (shapes match nn.Conv2d with groups).
    x = jax.random.normal(kx, (2, in_channels, 16, 16), dtype=jnp.float32)
    weight = 0.1 * jax.random.normal(
        kw, (out_channels, in_channels // groups, kernel_size, kernel_size),
        dtype=jnp.float32)
    bias = 0.05 * jax.random.normal(kb, (out_channels,), dtype=jnp.float32)

    out = large_kernel_conv(
        x, weight, bias, kernel_size=kernel_size, stride=stride, groups=groups)
    out = jax.block_until_ready(out)

    # Reference check against XLA's grouped conv (same semantics as PyTorch Conv2d).
    ref = jax.lax.conv_general_dilated(
        x, weight,
        window_strides=(stride, stride),
        padding=[(kernel_size // 2, kernel_size // 2)] * 2,
        dimension_numbers=("NCHW", "OIHW", "NCHW"),
        feature_group_count=groups,
    ) + bias.reshape(1, -1, 1, 1)
    assert out.shape == ref.shape, (out.shape, ref.shape)
    assert jnp.allclose(out, ref, atol=1e-4, rtol=1e-4)

    print("KERNEL_OK")
</pallas_src>

<mosaic_0001>
module attributes {stable_mosaic.version = 11 : i64} {
  func.func @_conv_kernel(%arg0: i32, %arg1: i32, %arg2: memref<1x1x8x1024xf32, #tpu.memory_space<vmem>>, %arg3: memref<1x8x200xf32, #tpu.memory_space<vmem>>, %arg4: memref<1x8x1xf32, #tpu.memory_space<vmem>>, %arg5: memref<1x1x8x896xf32, #tpu.memory_space<vmem>>) attributes {dimension_semantics = [#tpu.dimension_semantics<parallel>, #tpu.dimension_semantics<parallel>], iteration_bounds = array<i64: 2, 1>, scalar_prefetch = 0 : i64, scratch_operands = 0 : i64, tpu.core_type = #tpu.core_type<tc>, window_params = [{transform_indices = @transform_0, window_bounds = array<i64: 1, 1, 8, 1024>}, {transform_indices = @transform_1, window_bounds = array<i64: 1, 8, 200>}, {transform_indices = @transform_2, window_bounds = array<i64: 1, 8, 1>}, {transform_indices = @transform_3, window_bounds = array<i64: 1, 1, 8, 896>}]} {
    %c0 = arith.constant 0 : index
    %c0_0 = arith.constant 0 : index
    %c0_1 = arith.constant 0 : index
    %c0_2 = arith.constant 0 : index
    %0 = vector.load %arg2[%c0, %c0_0, %c0_1, %c0_2] : memref<1x1x8x1024xf32, #tpu.memory_space<vmem>>, vector<1x1x8x1024xf32>
    %1 = vector.shape_cast %0 : vector<1x1x8x1024xf32> to vector<8x1024xf32>
    %2 = vector.extract_strided_slice %1 {offsets = [0, 0], sizes = [8, 896], strides = [1, 1]} : vector<8x1024xf32> to vector<8x896xf32>
    %3 = vector.extract_strided_slice %1 {offsets = [0, 1], sizes = [8, 896], strides = [1, 1]} : vector<8x1024xf32> to vector<8x896xf32>
    %4 = vector.extract_strided_slice %1 {offsets = [0, 2], sizes = [8, 896], strides = [1, 1]} : vector<8x1024xf32> to vector<8x896xf32>
    %5 = vector.extract_strided_slice %1 {offsets = [0, 3], sizes = [8, 896], strides = [1, 1]} : vector<8x1024xf32> to vector<8x896xf32>
    %6 = vector.extract_strided_slice %1 {offsets = [0, 4], sizes = [8, 896], strides = [1, 1]} : vector<8x1024xf32> to vector<8x896xf32>
    %7 = vector.extract_strided_slice %1 {offsets = [0, 20], sizes = [8, 896], strides = [1, 1]} : vector<8x1024xf32> to vector<8x896xf32>
    %8 = vector.extract_strided_slice %1 {offsets = [0, 21], sizes = [8, 896], strides = [1, 1]} : vector<8x1024xf32> to vector<8x896xf32>
    %9 = vector.extract_strided_slice %1 {offsets = [0, 22], sizes = [8, 896], strides = [1, 1]} : vector<8x1024xf32> to vector<8x896xf32>
    %10 = vector.extract_strided_slice %1 {offsets = [0, 23], sizes = [8, 896], strides = [1, 1]} : vector<8x1024xf32> to vector<8x896xf32>
    %11 = vector.extract_strided_slice %1 {offsets = [0, 24], sizes = [8, 896], strides = [1, 1]} : vector<8x1024xf32> to vector<8x896xf32>
    %12 = vector.extract_strided_slice %1 {offsets = [0, 40], sizes = [8, 896], strides = [1, 1]} : vector<8x1024xf32> to vector<8x896xf32>
    %13 = vector.extract_strided_slice %1 {offsets = [0, 41], sizes = [8, 896], strides = [1, 1]} : vector<8x1024xf32> to vector<8x896xf32>
    %14 = vector.extract_strided_slice %1 {offsets = [0, 42], sizes = [8, 896], strides = [1, 1]} : vector<8x1024xf32> to vector<8x896xf32>
    %15 = vector.extract_strided_slice %1 {offsets = [0, 43], sizes = [8, 896], strides = [1, 1]} : vector<8x1024xf32> to vector<8x896xf32>
    %16 = vector.extract_strided_slice %1 {offsets = [0, 44], sizes = [8, 896], strides = [1, 1]} : vector<8x1024xf32> to vector<8x896xf32>
    %17 = vector.extract_strided_slice %1 {offsets = [0, 60], sizes = [8, 896], strides = [1, 1]} : vector<8x1024xf32> to vector<8x896xf32>
    %18 = vector.extract_strided_slice %1 {offsets = [0, 61], sizes = [8, 896], strides = [1, 1]} : vector<8x1024xf32> to vector<8x896xf32>
    %19 = vector.extract_strided_slice %1 {offsets = [0, 62], sizes = [8, 896], strides = [1, 1]} : vector<8x1024xf32> to vector<8x896xf32>
    %20 = vector.extract_strided_slice %1 {offsets = [0, 63], sizes = [8, 896], strides = [1, 1]} : vector<8x1024xf32> to vector<8x896xf32>
    %21 = vector.extract_strided_slice %1 {offsets = [0, 64], sizes = [8, 896], strides = [1, 1]} : vector<8x1024xf32> to vector<8x896xf32>
    %22 = vector.extract_strided_slice %1 {offsets = [0, 80], sizes = [8, 896], strides = [1, 1]} : vector<8x1024xf32> to vector<8x896xf32>
    %23 = vector.extract_strided_slice %1 {offsets = [0, 81], sizes = [8, 896], strides = [1, 1]} : vector<8x1024xf32> to vector<8x896xf32>
    %24 = vector.extract_strided_slice %1 {offsets = [0, 82], sizes = [8, 896], strides = [1, 1]} : vector<8x1024xf32> to vector<8x896xf32>
    %25 = vector.extract_strided_slice %1 {offsets = [0, 83], sizes = [8, 896], strides = [1, 1]} : vector<8x1024xf32> to vector<8x896xf32>
    %26 = vector.extract_strided_slice %1 {offsets = [0, 84], sizes = [8, 896], strides = [1, 1]} : vector<8x1024xf32> to vector<8x896xf32>
    %27 = tpu.concatenate %2, %3, %4, %5, %6, %7, %8, %9, %10, %11, %12, %13, %14, %15, %16, %17 in 0 : vector<8x896xf32>, vector<8x896xf32>, vector<8x896xf32>, vector<8x896xf32>, vector<8x896xf32>, vector<8x896xf32>, vector<8x896xf32>, vector<8x896xf32>, vector<8x896xf32>, vector<8x896xf32>, vector<8x896xf32>, vector<8x896xf32>, vector<8x896xf32>, vector<8x896xf32>, vector<8x896xf32>, vector<8x896xf32> -> vector<128x896xf32>
    %28 = tpu.concatenate %18, %19, %20, %21, %22, %23, %24, %25, %26 in 0 : vector<8x896xf32>, vector<8x896xf32>, vector<8x896xf32>, vector<8x896xf32>, vector<8x896xf32>, vector<8x896xf32>, vector<8x896xf32>, vector<8x896xf32>, vector<8x896xf32> -> vector<72x896xf32>
    %29 = tpu.concatenate %27, %28 in 0 : vector<128x896xf32>, vector<72x896xf32> -> vector<200x896xf32>
    %c0_3 = arith.constant 0 : index
    %c0_4 = arith.constant 0 : index
    %c0_5 = arith.constant 0 : index
    %30 = vector.load %arg3[%c0_3, %c0_4, %c0_5] : memref<1x8x200xf32, #tpu.memory_space<vmem>>, vector<1x8x200xf32>
    %31 = vector.shape_cast %30 : vector<1x8x200xf32> to vector<8x200xf32>
    %cst = arith.constant dense<0.000000e+00> : vector<8x896xf32>
    %32 = tpu.matmul %31, %29, %cst {dimension_numbers = #tpu.dot_dimension_numbers<[1], [0], [0], [1], [0, 0, 1, 1], [], []>} : vector<8x200xf32>, vector<200x896xf32>, vector<8x896xf32> -> vector<8x896xf32>
    %c0_6 = arith.constant 0 : index
    %c0_7 = arith.constant 0 : index
    %c0_8 = arith.constant 0 : index
    %33 = vector.load %arg4[%c0_6, %c0_7, %c0_8] : memref<1x8x1xf32, #tpu.memory_space<vmem>>, vector<1x8x1xf32>
    %34 = vector.shape_cast %33 : vector<1x8x1xf32> to vector<8x1xf32>
    %35 = vector.broadcast %34 : vector<8x1xf32> to vector<8x896xf32>
    %36 = arith.addf %32, %35 : vector<8x896xf32>
    %c0_9 = arith.constant 0 : index
    %c0_10 = arith.constant 0 : index
    %c0_11 = arith.constant 0 : index
    %c0_12 = arith.constant 0 : index
    %37 = vector.load %arg5[%c0_9, %c0_10, %c0_11, %c0_12] : memref<1x1x8x896xf32, #tpu.memory_space<vmem>>, vector<1x1x8x896xf32>
    %38 = vector.shape_cast %37 : vector<1x1x8x896xf32> to vector<8x896xf32>
    %39 = vector.shape_cast %36 : vector<8x896xf32> to vector<1x1x8x896xf32>
    tpu.vector_store %arg5[%c0_9, %c0_10, %c0_11, %c0_12], %39 {strides = array<i32>} : memref<1x1x8x896xf32, #tpu.memory_space<vmem>>, vector<1x1x8x896xf32>,
    return
  }
  func.func @transform_0(%arg0: i32, %arg1: i32) -> (i32, i32, i32, i32) {
    %c0_i32 = arith.constant 0 : i32
    %c0_i32_0 = arith.constant 0 : i32
    %c0_i32_1 = arith.constant 0 : i32
    return %arg0, %arg1, %c0_i32, %c0_i32_0 : i32, i32, i32, i32
  }
  func.func @transform_1(%arg0: i32, %arg1: i32) -> (i32, i32, i32) {
    %c0_i32 = arith.constant 0 : i32
    %c0_i32_0 = arith.constant 0 : i32
    %c0_i32_1 = arith.constant 0 : i32
    return %arg0, %c0_i32, %c0_i32_0 : i32, i32, i32
  }
  func.func @transform_2(%arg0: i32, %arg1: i32) -> (i32, i32, i32) {
    %c0_i32 = arith.constant 0 : i32
    %c0_i32_0 = arith.constant 0 : i32
    %c0_i32_1 = arith.constant 0 : i32
    return %arg0, %c0_i32, %c0_i32_0 : i32, i32, i32
  }
  func.func @transform_3(%arg0: i32, %arg1: i32) -> (i32, i32, i32, i32) {
    %c0_i32 = arith.constant 0 : i32
    %c0_i32_0 = arith.constant 0 : i32
    %c0_i32_1 = arith.constant 0 : i32
    return %arg0, %arg1, %c0_i32, %c0_i32_0 : i32, i32, i32, i32
  }
}

</mosaic_0001>

<bundles_post_ra>
// kernel: tpu_custom_call.1
= control target key start
LH: loop header
LB: loop body
LE: loop exit
PB: predicated region body
PF: predicated region fallthrough
CT: control target
= control target key end

     0   :  { %8 = vsyncpa [#allocation3], 0  ;;  %s3422_s0 = inlined_call_operand.hbm [shape: f32[2,1,8,1024], index: 0, kind: input, shape index: {}]   ;;  %s3423_s1 = inlined_call_operand.hbm [shape: f32[2,8,200], index: 1, kind: input, shape index: {}]   ;;  %s3424_s2 = inlined_call_operand.vmem [shape: f32[2,8,1], index: 2, kind: input, shape index: {}]   ;;  %s3425_s3 = inlined_call_operand.hbm [shape: f32[2,1,8,896], index: 3, kind: output, shape index: {}]  }
   0x1   :  { %10 = vsyncpa [#allocation3 + $0x1], 0 }
   0x2   :  { %11 = vsyncpa [#allocation6], 0 }
   0x3   :  { %13 = vsyncpa [#allocation6 + $0x1], 0 }
   0x4   :  { %14 = vsyncpa [#allocation4], 0 }
   0x5   :  { %16 = vsyncpa [#allocation4 + $0x1], 0  ;;  %s2407_s12 = smov 0   ;;  %s2409_s13 = smov 0  }
   0x6   :  { %s2411_s14 = smov 0   ;;  %s2413_s15 = smov 0  }
   0x7   :  { %s2415_s16 = smov 0   ;;  %s2417_s17 = smov 0  }
   0x8 LB: > { %s1474_s18 = sadd.s32 4294967295, %s2362_s17   ;;  %s1475_s19 = sadd.s32 4294967294, %s2362_s17   ;;  %s2362_s17 = sphi %s2417_s17, %s22_s17   ;;  %s2358_s16 = sphi %s2415_s16, %s3479_s16   ;;  %s2354_s15 = sphi %s2413_s15, %s3478_s15   ;;  %s2350_s14 = sphi %s2411_s14, %s3477_s14   ;;  %s2346_s13 = sphi %s2409_s13, %s3476_s13   ;;  %s2342_s12 = sphi %s2407_s12, %s3475_s12  }
   0x9   : > { %s34_s20 = sadd.s32 1, %s2358_s16  ;;  %s43_s21 = sadd.s32 1, %s2350_s14 }
   0xa   : > { %p36_p0 = scmp.ge.s32.totalorder %s34_s20, 2  ;;  %p50_p1 = scmp.ne.s32.totalorder %s2350_s14, %s2346_s13 }
   0xb   : > { %p51_p2 = scmp.eq.s32.totalorder %s2362_s17, 0  ;;  %p56_p3 = scmp.ne.s32.totalorder %s2346_s13, %s2342_s12 }
   0xc   : > { %s3481_s20 = smov (%p36_p0, %s34_s20), 0  ;;  %p57_p5 = scmp.eq.s32.totalorder %s1474_s18, 0 }
   0xd   : > { %p2448_p4 = por %p51_p2, %p50_p1  ;;  %s38_s23 = ssub.s32 %s2358_s16, %s3481_s20 }
   0xe   : > { %p134_p6 = scmp.eq.s32.totalorder %s1474_s18, 1  ;;  %p41_p7 = scmp.eq.s32.totalorder %s38_s23, 0 }
   0xf   : > { %p2454_p8 = por %p57_p5, %p56_p3  ;;  %p140_p10 = scmp.eq.s32.totalorder %s1475_s19, 1 }
  0x10   : > { %p2458_p9 = por %p134_p6, %p50_p1  ;;  %p1696_p13 = scmp.lt.s32.totalorder %s2362_s17, 2 }
  0x11   : > { %s3443_s24 = scalar_select %p2454_p8, 1, 0 }
  0x12   : > { %s3444_s25 = scalar_select %p2458_p9, 1, 0 }
  0x13   : > { %s2463_s26 = scalar_select %p41_p7, %s2350_s14, %s43_s21  }
  0x14   : > { %p2465_p11 = por %p140_p10, %p56_p3  ;;  %s2472_s28 = sand.u32 1, %s2350_s14  }
  0x15   : > { %s1478_s29 = sshll.u32 %s2472_s28, 6  ;;  %s1495_s30 = sshll.u32 %s2358_s16, 10 }
  0x16   : > { %s3445_s27 = scalar_select %p2465_p11, 1, 0 }
  0x17   : > { %s2479_s6 = scalar_lea.hbm %s3422_s0, %s1495_s30  ;;  %s164_s7 = scalar_lea.vmem [#allocation2], %s1478_s29 }
  0x18   : > { %s174_s8 = sshll.u32 %s164_s7, 4  ;;  %p2485_p0 = pnand %p1696_p13, %p2448_p4  ;;  %s2481_s8 = int_to_ptr.vmem [resolvable:$true] %s174_s8 }
  0x19   : > { %s161_s10 = scalar_lea.sflag [#allocation3], %s2472_s28  ;;  %s2216_s11 = scalar_lea.hbm %s2479_s6, 1024 }
  0x1a   : > { %p2217_p3 = scmp.ne.s32.totalorder %s2479_s6, %s2216_s11  ;;  %p2218_p5 = pneg %p2485_p0 }
  0x1b   : > { %s2221_s21 = scalar_lea.hbm %s3422_s0, 2048  ;;  %p2222_p4 = scmp.lt.u32.totalorder %s2479_s6, %s3422_s0 }
  0x1c   : > { %p2219_p6 = pnand %p2218_p5, %p2217_p3  ;;  %p2223_p10 = scmp.lt.u32.totalorder %s2221_s21, %s2216_s11 }
  0x1d   : > { %p2225_p12 = scmp.lt.u32.totalorder %s2216_s11, %s2479_s6 }
  0x1e   : > { %p2220_p7 = pneg %p2219_p6  ;;  %p2224_p13 = por %p2223_p10, %p2222_p4 }
  0x20   : > { %p2226_p1 = por %p2225_p12, %p2224_p13 }
  0x22   : > { %p2227_p2 = pnand %p2226_p1, %p2220_p7 }
  0x24   : > { %2230 = shalt.err (!%p2227_p2)
}
  0x25   : > { %s2231_s29 = scalar_lea.vmem %s2481_s8, 1024  ;;  %s2364_s30 = smov [#allocation2]  }
  0x26   : > { %p2232_p3 = scmp.ne.s32.totalorder %s2481_s8, %s2231_s29  ;;  %s2236_s4 = sshll.u32 %s2364_s30, 4  ;;  %s2237_s4 = int_to_ptr.vmem [resolvable:$false] %s2236_s4 }
  0x27   : > { %s2238_s5 = scalar_lea.vmem %s2237_s4, 2048  ;;  %p2239_p9 = scmp.lt.s32.totalorder %s2481_s8, %s2237_s4 }
  0x28   : > { %p2234_p6 = pnand %p2232_p3, %p2218_p5  ;;  %p2240_p4 = scmp.lt.s32.totalorder %s2238_s5, %s2231_s29 }
  0x2a   : > { %p2235_p11 = pneg %p2234_p6  ;;  %p2241_p10 = por %p2240_p4, %p2239_p9 }
  0x2c   : > { %p2242_p12 = pnand %p2241_p10, %p2235_p11 }
  0x2e   : > { %2245 = shalt.err (!%p2242_p12)
}
  0x2f   : > { %1688 = dma.hbm_to_vmem [thread:$0]  (!%p2485_p0), %s2479_s6, 1024, %s2481_s8, %s161_s10  }
  0x30   : > { %p3447_p1 = scmp.lt.s32.totalorder %s2362_s17, 3  ;;  %p3448_p2 = scmp.ge.s32.totalorder %s2362_s17, 1 }
  0x31   : > { %s1481_s11 = sshll.u32 %s2472_s28, 4  ;;  %s1496_s18 = sshll.u32 %s2358_s16, 8 }
  0x32   : > { %p2521_p7 = pnand %p3448_p2, %p3447_p1  ;;  %s2530_s22 = scalar_lea.hbm %s3423_s1, %s1496_s18 }
  0x33   : > { %s185_s23 = scalar_lea.vmem [#allocation5], %s1481_s11  ;;  %s182_s6 = scalar_lea.sflag [#allocation6], %s2472_s28 }
  0x34   : > { %s3449_s7 = scalar_select %p2521_p7, 1, 0 }
  0x35   : > { %s193_s29 = sshll.u32 %s185_s23, 4  ;;  %s2246_s8 = scalar_lea.hbm %s2530_s22, 256  ;;  %s194_s29 = int_to_ptr.vmem [resolvable:$true] %s193_s29 }
  0x36   : > { %p2247_p9 = scmp.ne.s32.totalorder %s2530_s22, %s2246_s8  ;;  %s2251_s4 = scalar_lea.hbm %s3423_s1, 512 }
  0x37   : > { %p2252_p3 = scmp.lt.u32.totalorder %s2530_s22, %s3423_s1  ;;  %p2253_p6 = scmp.lt.u32.totalorder %s2251_s4, %s2246_s8 }
  0x38   : > { %p2249_p11 = pnand %p2247_p9, %p2218_p5  ;;  %p2255_p10 = scmp.lt.u32.totalorder %s2246_s8, %s2530_s22 }
  0x39   : > { %p2254_p4 = por %p2253_p6, %p2252_p3 }
  0x3a   : > { %p2250_p13 = pneg %p2249_p11 }
  0x3b   : > { %p2256_p12 = por %p2255_p10, %p2254_p4 }
  0x3d   : > { %p2257_p1 = pnand %p2256_p12, %p2250_p13 }
  0x3f   : > { %2260 = shalt.err (!%p2257_p1)
}
  0x40   : > { %s2261_s28 = scalar_lea.vmem %s194_s29, 256  ;;  %s2365_s11 = smov [#allocation5]  }
  0x41   : > { %p2262_p2 = scmp.ne.s32.totalorder %s194_s29, %s2261_s28  ;;  %s2266_s19 = sshll.u32 %s2365_s11, 4  ;;  %s2267_s19 = int_to_ptr.vmem [resolvable:$false] %s2266_s19 }
  0x42   : > { %s2268_s21 = scalar_lea.vmem %s2267_s19, 512  ;;  %p2269_p8 = scmp.lt.s32.totalorder %s194_s29, %s2267_s19 }
  0x43   : > { %p2264_p9 = pnand %p2262_p2, %p2218_p5  ;;  %p2270_p7 = scmp.lt.s32.totalorder %s2268_s21, %s2261_s28 }
  0x45   : > { %p2265_p11 = pneg %p2264_p9  ;;  %p2271_p3 = por %p2270_p7, %p2269_p8 }
  0x47   : > { %p2272_p6 = pnand %p2271_p3, %p2265_p11 }
  0x49   : > { %2275 = shalt.err (!%p2272_p6)
}
  0x4a   : > { %1691 = dma.hbm_to_vmem [thread:$0]  (!%p2485_p0), %s2530_s22, 256, %s194_s29, %s182_s6  }
  0x4b   : > { %p3450_p13 = scmp.ne.s32.totalorder %s3449_s7, 0 }
  0x4c   : > { %s2555_s23 = sand.u32 (!%p3450_p13), 1, %s2346_s13   ;;  %p3451_p8 = scmp.ne.s32.totalorder (!%p3450_p13), %s3443_s24, 0 }
  0x4d   : > { %209 = sbr.rel (%p3450_p13) target bundleno = 705 (0x2c1), region = 32  ;;  %s1485_s8 = sshll.u32 (!%p3450_p13), %s2555_s23, 6 }
  0x4e   : > { %s212_s10 = scalar_lea.sflag (!%p3450_p13), [#allocation3], %s2555_s23  ;;  %s2559_s30 = scalar_lea.vmem (!%p3450_p13), [#allocation2], %s1485_s8 }
  0x54   : > { %2329 = dma.done.wait (%p3451_p8), %s212_s10, 1024  }
  0x55   : > { %2331 = vsyncadd (%p3451_p8), %s212_s10, 4294966272  ;;  %s1486_s9 = sshll.u32 %s2555_s23, 4  ;;  %s221_s7 = scalar_lea.sflag [#allocation6], %s2555_s23 }
  0x56   : > { %s2567_s22 = scalar_lea.vmem [#allocation5], %s1486_s9 }
  0x57   : > { %2333 = dma.done.wait (%p3451_p8), %s221_s7, 256  }
  0x58   : > { %2335 = vsyncadd (%p3451_p8), %s221_s7, 4294967040  ;;  %v2574_v0 = vld [vmem:[%s2559_s30 + $0x20] sm:$0xff]  ;;  %v2577_v1 = vld [vmem:[%s2559_s30 + $0x28] sm:$0xff]  ;;  %s2366_s24 = smov 127   ;;  %s2367_s29 = smov 126   ;;  %vm292_vm0 = vcmask 1039360  }
  0x59   : > { %v2580_v2 = vld [vmem:[%s2559_s30 + $0x8] sm:$0xff]  ;;  %v2584_v3 = vpack.i.bf16 %v2577_v1, %v2574_v0  ;;  %v2587_v4 = vld [vmem:[%s2559_s30 + $0x10] sm:$0xff]  ;;  %v2590_v5 = vld [vmem:[%s2559_s30] sm:$0xff]  ;;  %s2368_s6 = smov 125   ;;  %s2369_s4 = smov 108   ;;  %vm323_vm1 = vcmask 1031168  }
  0x5a   : > { %v2593_v6 = vld [vmem:[%s2559_s30 + $0x18] sm:$0xff]  ;;  %v2597_v7 = vpack.i.bf16 %v2587_v4, %v2580_v2  ;;  %s2370_s5 = smov 109   ;;  %s2371_s18 = smov 107   ;;  %v2666_v10 = vld [vmem:[%s2559_s30 + $0x30] sm:$0xff]  ;;  %vm354_vm2 = vcmask 1022976   ;;  %vm757_vm3 = vcmask 891904  }
  0x5b   : > { %1777 = vrot.lane.b32.xlu1 %v2584_v3, %s2366_s24  ;;  %v1771_v8 = vpack.i.bf16 %v2590_v5, %v2593_v6  ;;  %s2372_s28 = smov 106   ;;  %s2373_s11 = smov 105   ;;  %v1876_v9 = vpack.i.bf16 %v2593_v6, %v2590_v5  ;;  %v2669_v11 = vld [vmem:[%s2559_s30 + $0x38] sm:$0xff]  ;;  %vm416_vm4 = vcmask 883712   ;;  %vm447_vm5 = vcmask 875520  }
  0x5c   : > { %1767 = vrot.lane.b32.xlu0 %v2597_v7, %s2366_s24  ;;  %s2374_s19 = smov 124   ;;  %s2375_s21 = smov 104   ;;  %v2674_v12 = vpack.i.bf16 %v2669_v11, %v2666_v10  ;;  %vm478_vm6 = vcmask 867328   ;;  %vm1044_vm7 = vcmask 588800   ;;  %vm509_vm8 = vcmask 859136  }
  0x5d   : > { %s2376_s8 = smov 88   ;;  %s3428_s10 = smov 87   ;;  %vm385_vm9 = vcmask 1014784   ;;  %vm540_vm10 = vcmask 850944   ;;  %vm571_vm11 = vcmask 719872   ;;  %vm602_vm12 = vcmask 711680  }
  0x5e   : > { %s2378_s9 = smov 85   ;;  %s2379_s7 = smov 86   ;;  %vm633_vm13 = vcmask 703488   ;;  %vm664_vm14 = vcmask 695296   ;;  %vm695_vm15 = vcmask 687104  }
  0x5f   : > { %1782 = vrot.lane.b32.xlu1 %v2597_v7, %s2367_s29  ;;  %p256_p0 = scmp.lt.s32.totalorder %s2354_s15, 1  ;;  %p3472_p7 = scmp.ne.s32.totalorder %s3444_s25, 0 }
  0x60   : > { %1772 = vrot.lane.b32.xlu0 %v1771_v8, %s2366_s24 }
  0x63   : > { %1792 = vrot.lane.b32.xlu1 %v2597_v7, %s2368_s6 }
  0x64   : > { %1787 = vrot.lane.b32.xlu0 %v1771_v8, %s2367_s29 }
  0x67   : > { %1802 = vrot.lane.b32.xlu1 %v2584_v3, %s2367_s29 }
  0x68   : > { %1797 = vrot.lane.b32.xlu0 %v1771_v8, %s2368_s6 }
  0x6b   : > { %1812 = vrot.lane.b32.xlu1 %v2597_v7, %s2369_s4 }
  0x6c   : > { %1807 = vrot.lane.b32.xlu0 %v2584_v3, %s2368_s6 }
  0x6f   : > { %1822 = vrot.lane.b32.xlu1 %v2597_v7, %s2370_s5 }
  0x70   : > { %1817 = vrot.lane.b32.xlu0 %v1771_v8, %s2369_s4 }
  0x73   : > { %1832 = vrot.lane.b32.xlu1 %v2584_v3, %s2369_s4 }
  0x74   : > { %1827 = vrot.lane.b32.xlu0 %v1771_v8, %s2370_s5 }
  0x77   : > { %1842 = vrot.lane.b32.xlu1 %v2597_v7, %s2371_s18 }
  0x78   : > { %1837 = vrot.lane.b32.xlu0 %v2584_v3, %s2370_s5 }
  0x7b   : > { %1852 = vrot.lane.b32.xlu1 %v2597_v7, %s2372_s28 }
  0x7c   : > { %1847 = vrot.lane.b32.xlu0 %v1771_v8, %s2371_s18 }
  0x7f   : > { %1862 = vrot.lane.b32.xlu1 %v2584_v3, %s2371_s18 }
  0x80   : > { %1857 = vrot.lane.b32.xlu0 %v1771_v8, %s2372_s28 }
  0x83   : > { %495 = vrot.lane.b32.xlu1 %v2580_v2, %s2373_s11 }
  0x84   : > { %1867 = vrot.lane.b32.xlu0 %v2584_v3, %s2372_s28 }
  0x87   : > { %499 = vrot.lane.b32.xlu1 %v2593_v6, %s2373_s11 }
  0x88   : > { %497 = vrot.lane.b32.xlu0 %v2587_v4, %s2373_s11 }
  0x8b   : > { %501 = vrot.lane.b32.xlu1 %v2574_v0, %s2373_s11 }
  0x8c   : > { %493 = vrot.lane.b32.xlu0 %v2590_v5, %s2373_s11 }
  0x8f   : > { %1872 = vrot.lane.b32.xlu1 %v2597_v7, %s2374_s19 }
  0x90   : > { %503 = vrot.lane.b32.xlu0 %v2577_v1, %s2373_s11 }
  0x93   : > { %1882 = vrot.lane.b32.xlu1 %v2584_v3, %s2374_s19 }
  0x94   : > { %1877 = vrot.lane.b32.xlu0 %v1876_v9, %s2374_s19 }
  0x97   : > { %1892 = vrot.lane.b32.xlu1 %v1876_v9, %s2375_s21 }
  0x98   : > { %1887 = vrot.lane.b32.xlu0 %v2597_v7, %s2375_s21 }
  0x9b   : > { %1902 = vrot.lane.b32.xlu1 %v2597_v7, %s2376_s8 }
  0x9c   : > { %1897 = vrot.lane.b32.xlu0 %v2584_v3, %s2375_s21 }
  0x9f   : > { %1912 = vrot.lane.b32.xlu1 %v1876_v9, %s2376_s8 }
  0xa0   : > { %1907 = vrot.lane.b32.xlu0 %v2597_v7, %s3428_s10 }
  0xa3   : > { %1922 = vrot.lane.b32.xlu1 %v1876_v9, %s3428_s10 }
  0xa4   : > { %1917 = vrot.lane.b32.xlu0 %v2584_v3, %s2376_s8 }
  0xa7   : > { %1932 = vrot.lane.b32.xlu1 %v2674_v12, %s2366_s24  ;;  %s2380_s24 = smov 68  }
  0xa8   : > { %1927 = vrot.lane.b32.xlu0 %v2584_v3, %s3428_s10  ;;  %s2381_s10 = smov 84  }
  0xab   : > { %1942 = vrot.lane.b32.xlu1 %v2597_v7, %s2378_s9 }
  0xac   : > { %1937 = vrot.lane.b32.xlu0 %v2597_v7, %s2379_s7 }
  0xaf   : > { %1952 = vrot.lane.b32.xlu1 %v2584_v3, %s2379_s7 }
  0xb0   : > { %1947 = vrot.lane.b32.xlu0 %v1876_v9, %s2379_s7 }
  0xb3   : > { %656 = vrot.lane.b32.xlu1 %v2574_v0, %s2378_s9 }
  0xb4   : > { %1957 = vrot.lane.b32.xlu0 %v1876_v9, %s2378_s9 }
  0xb7   : > { %1967 = vrot.lane.b32.xlu1 %v2674_v12, %s2368_s6  ;;  %s3452_s6 = smov 87  }
  0xb8   : > { %1962 = vrot.lane.b32.xlu0 %v2674_v12, %s2367_s29  ;;  %s2382_s29 = smov 67  }
  0xbb   : > { %1977 = vrot.lane.b32.xlu1 %v2597_v7, %s2380_s24 }
  0xbc   : > { %1972 = vrot.lane.b32.xlu0 %v2597_v7, %s2381_s10 }
  0xbf   : > { %687 = vrot.lane.b32.xlu1 %v2574_v0, %s2381_s10 }
  0xc0   : > { %1982 = vrot.lane.b32.xlu0 %v1876_v9, %s2381_s10 }
  0xc3   : > { %718 = vrot.lane.b32.xlu1 %v2574_v0, %s2380_s24 }
  0xc4   : > { %1987 = vrot.lane.b32.xlu0 %v1876_v9, %s2380_s24 }
  0xc7   : > { %1997 = vrot.lane.b32.xlu1 %v2674_v12, %s2370_s5 }
  0xc8   : > { %1992 = vrot.lane.b32.xlu0 %v2674_v12, %s2369_s4  ;;  %s257_s4 = scalar_select %p256_p0, %s2354_s15, 1 }
  0xca   : > { %s1487_s5 = sshll.u32 %s257_s4, 3 }
  0xcb   : > { %2012 = vrot.lane.b32.xlu1 %v2674_v12, %s2371_s18 }
  0xcc   : > { %2002 = vrot.lane.b32.xlu0 %v2597_v7, %s2382_s29 }
  0xcd   : > { %v2714_v13 = vpop.permute.xlu1 %1777 }
  0xce   : > { %v1768_v14 = vpop.permute.xlu0 %1767  ;;  %v1780_v17 = vunpack.i.h.bf16 %v2714_v13  ;;  %v1779_v18 = vunpack.i.l.bf16 %v2714_v13 }
  0xcf   : > { %v1770_v15 = vunpack.i.h.bf16 %v1768_v14  ;;  %v1769_v16 = vunpack.i.l.bf16 %v1768_v14 }
  0xd0   : > { %2007 = vrot.lane.b32.xlu0 %v1876_v9, %s2382_s29  ;;  %v2726_v27 = vsel %vm292_vm0, %v1779_v18, %v1780_v17 }
  0xd1   : > { %v1783_v19 = vpop.permute.xlu1 %1782  ;;  %v294_v20 = vsel %vm292_vm0, %v1769_v16, %v1770_v15 }
  0xd2   : > { %v1785_v21 = vunpack.i.h.bf16 %v1783_v19  ;;  %v1784_v22 = vunpack.i.l.bf16 %v1783_v19  ;;  %v1773_v23 = vpop.permute.xlu0 %1772  ;;  %v1497_v24 = vpack.c.bf16 %v294_v20, %v2580_v2 }
  0xd3   : > { %v1775_v25 = vunpack.i.h.bf16 %v1773_v23  ;;  %v1774_v26 = vunpack.i.l.bf16 %v1773_v23 }
  0xd4   : > { %1498 = vmatprep.subr.bf16.mxu0 %v1497_v24  ;;  %2017 = vrot.lane.b32.xlu0 %v2674_v12, %s2372_s28  ;;  %v325_v36 = vsel %vm323_vm1, %v1784_v22, %v1785_v21 }
  0xd5   : > { %v295_v28 = vsel %vm292_vm0, %v1770_v15, %v1774_v26  ;;  %v1793_v29 = vpop.permute.xlu1 %1792  ;;  %v293_v30 = vsel %vm292_vm0, %v1775_v25, %v1769_v16  ;;  %v296_v31 = vsel %vm292_vm0, %v1774_v26, %v1779_v18 }
  0xd6   : > { %v2021_v32 = vpack.i.bf16 %v295_v28, %v294_v20  ;;  %v1795_v33 = vunpack.i.h.bf16 %v1793_v29  ;;  %v1794_v34 = vunpack.i.l.bf16 %v1793_v29  ;;  %v1788_v35 = vpop.permute.xlu0 %1787  ;;  %v1499_v37 = vpack.c.bf16 %v293_v30, %v2590_v5 }
  0xd7   : > { %v2031_v38 = vpack.i.bf16 %v2726_v27, %v296_v31  ;;  %v1789_v39 = vunpack.i.l.bf16 %v1788_v35  ;;  %v1545_v40 = vpack.c.bf16 %v296_v31, %v2593_v6  ;;  %v1547_v41 = vpack.c.bf16 %v295_v28, %v2587_v4 }
  0xd8   : > { %2022 = vrot.lane.b32.xlu1 %v2021_v32, %s2382_s29  ;;  %v356_v42 = vsel %vm354_vm2, %v1794_v34, %v1795_v33  ;;  %v1790_v43 = vunpack.i.h.bf16 %v1788_v35  ;;  %1500 = vmatpush1.bf16.msra.mxu0 %v1499_v37  ;;  %v2026_v46 = vpack.i.bf16 %v293_v30, %v2574_v0 }
  0xd9   : > { %2032 = vrot.lane.b32.xlu0 %v2031_v38, %s2382_s29  ;;  %v2739_v44 = vpop.permute.xlu1 %1802  ;;  %v1501_v45 = vpack.c.bf16 %v356_v42, %v325_v36  ;;  %1546 = vmatprep.subr.bf16.mxu1 %v1545_v40  ;;  %v326_v52 = vsel %vm323_vm1, %v1785_v21, %v1789_v39 }
  0xda   : > { %v1798_v47 = vpop.permute.xlu0 %1797  ;;  %1548 = vmatpush1.bf16.msra.mxu1 %v1547_v41  ;;  %v1805_v48 = vunpack.i.h.bf16 %v2739_v44  ;;  %v1804_v49 = vunpack.i.l.bf16 %v2739_v44  ;;  %v324_v54 = vsel %vm323_vm1, %v1790_v43, %v1784_v22  ;;  %v2036_v62 = vpack.i.bf16 %v326_v52, %v325_v36 }
  0xdb   : > { %v1800_v50 = vunpack.i.h.bf16 %v1798_v47  ;;  %v1799_v51 = vunpack.i.l.bf16 %v1798_v47  ;;  %1502 = vmatprep.subr.bf16.mxu0 %v1501_v45 }
  0xdc   : > { %2027 = vrot.lane.b32.xlu1 %v2026_v46, %s2382_s29  ;;  %v2758_v63 = vsel %vm323_vm1, %v1804_v49, %v1805_v48  ;;  %v327_v0 = vsel %vm323_vm1, %v1789_v39, %v1804_v49 }
  0xdd   : > { %v2746_v53 = vpop.permute.xlu1 %1812  ;;  %v355_v55 = vsel %vm354_vm2, %v1800_v50, %v1794_v34  ;;  %v357_v56 = vsel %vm354_vm2, %v1795_v33, %v1799_v51  ;;  %v2046_v15 = vpack.i.bf16 %v327_v0, %v324_v54 }
  0xde   : > { %v2751_v57 = vpop.permute.xlu0 %1807  ;;  %v1503_v58 = vpack.c.bf16 %v355_v55, %v324_v54  ;;  %v2041_v59 = vpack.i.bf16 %v357_v56, %v356_v42  ;;  %v2051_v6 = vpack.i.bf16 %v355_v55, %v2758_v63  ;;  %v1551_v16 = vpack.c.bf16 %v357_v56, %v326_v52 }
  0xdf   : > { %v1810_v60 = vunpack.i.h.bf16 %v2751_v57  ;;  %v1809_v61 = vunpack.i.l.bf16 %v2751_v57  ;;  %v1815_v18 = vunpack.i.h.bf16 %v2746_v53  ;;  %v1814_v19 = vunpack.i.l.bf16 %v2746_v53 }
  0xe0   : > { %1504 = vmatpush1.bf16.msra.mxu0 %v1503_v58  ;;  %2042 = vrot.lane.b32.xlu0 %v2041_v59, %s2382_s29 }
  0xe1   : > { %2037 = vrot.lane.b32.xlu1 %v2036_v62, %s2382_s29  ;;  %v1823_v2 = vpop.permute.xlu1 %1822  ;;  %v358_v3 = vsel %vm354_vm2, %v1799_v51, %v1809_v61  ;;  %v2767_v4 = vsel %vm354_vm2, %v1809_v61, %v1810_v60  ;;  %v2781_v26 = vsel %vm416_vm4, %v1814_v19, %v1815_v18 }
  0xe2   : > { %v1818_v5 = vpop.permute.xlu0 %1817  ;;  %v1549_v7 = vpack.c.bf16 %v358_v3, %v327_v0  ;;  %v1599_v8 = vpack.c.bf16 %v2767_v4, %v2758_v63  ;;  %v1825_v9 = vunpack.i.h.bf16 %v1823_v2  ;;  %v1824_v14 = vunpack.i.l.bf16 %v1823_v2 }
  0xe3   : > { %v1819_v20 = vunpack.i.l.bf16 %v1818_v5  ;;  %v2056_v24 = vpack.i.bf16 %v2767_v4, %v358_v3  ;;  %v1820_v36 = vunpack.i.h.bf16 %v1818_v5 }
  0xe4   : > { %2052 = vrot.lane.b32.xlu0 %v2051_v6, %s2382_s29  ;;  %1550 = vmatprep.subr.bf16.mxu1 %v1549_v7  ;;  %v759_v25 = vsel %vm757_vm3, %v1824_v14, %v1825_v9 }
  0xe5   : > { %2047 = vrot.lane.b32.xlu1 %v2046_v15, %s2382_s29  ;;  %1552 = vmatpush1.bf16.msra.mxu1 %v1551_v16  ;;  %v2776_v21 = vpop.permute.xlu1 %1832  ;;  %v2784_v28 = vsel %vm416_vm4, %v1815_v18, %v1819_v20  ;;  %v2810_v51 = vsel %vm416_vm4, %v1820_v36, %v1814_v19 }
  0xe6   : > { %v1828_v22 = vpop.permute.xlu0 %1827  ;;  %v2066_v34 = vpack.i.bf16 %v2784_v28, %v2781_v26  ;;  %v1834_v37 = vunpack.i.l.bf16 %v2776_v21  ;;  %v1835_v40 = vunpack.i.h.bf16 %v2776_v21 }
  0xe7   : > { %v1829_v23 = vunpack.i.l.bf16 %v1828_v22  ;;  %v1830_v38 = vunpack.i.h.bf16 %v1828_v22 }
  0xe8   : > { %v2813_v52 = vsel %vm416_vm4, %v1819_v20, %v1834_v37  ;;  %v2818_v55 = vsel %vm416_vm4, %v1834_v37, %v1835_v40  ;;  %v2874_v37 = vld [vmem:[%s2567_s22 + $0x8] sm:$0xff] }
  0xe9   : > { %2057 = vrot.lane.b32.xlu1 %v2056_v24, %s2382_s29  ;;  %v1843_v29 = vpop.permute.xlu1 %1842  ;;  %v760_v30 = vsel %vm757_vm3, %v1825_v9, %v1829_v23  ;;  %v758_v50 = vsel %vm757_vm3, %v1830_v38, %v1824_v14  ;;  %v2081_v14 = vpack.i.bf16 %v2818_v55, %v2813_v52  ;;  %1488 = vmatprep.mubr.msk.f32.mxu0 %vm1044_vm7, %v2874_v37 }
  0xea   : > { %v2788_v31 = vpop.permute.xlu0 %1837  ;;  %v2061_v32 = vpack.i.bf16 %v760_v30, %v759_v25  ;;  %v1845_v41 = vunpack.i.h.bf16 %v1843_v29  ;;  %v1844_v42 = vunpack.i.l.bf16 %v1843_v29  ;;  %1489 = vmatprep.mubr.msk.f32.mxu1 %vm1044_vm7, %v2874_v37 }
  0xeb   : > { %v1839_v33 = vunpack.i.l.bf16 %v2788_v31  ;;  %v1840_v35 = vunpack.i.h.bf16 %v2788_v31 }
  0xec   : > { %2062 = vrot.lane.b32.xlu0 %v2061_v32, %s2382_s29  ;;  %v2821_v56 = vsel %vm447_vm5, %v1844_v42, %v1845_v41 }
  0xed   : > { %2067 = vrot.lane.b32.xlu1 %v2066_v34, %s2382_s29  ;;  %v1853_v39 = vpop.permute.xlu1 %1852  ;;  %v761_v46 = vsel %vm757_vm3, %v1829_v23, %v1839_v33  ;;  %v762_v47 = vsel %vm757_vm3, %v1839_v33, %v1840_v35 }
  0xee   : > { %v1848_v43 = vpop.permute.xlu0 %1847  ;;  %v2071_v54 = vpack.i.bf16 %v761_v46, %v758_v50  ;;  %v1855_v59 = vunpack.i.h.bf16 %v1853_v39  ;;  %v1854_v61 = vunpack.i.l.bf16 %v1853_v39  ;;  %v2076_v0 = vpack.i.bf16 %v2810_v51, %v762_v47 }
  0xef   : > { %v1849_v45 = vunpack.i.l.bf16 %v1848_v43  ;;  %v1850_v2 = vunpack.i.h.bf16 %v1848_v43 }
  0xf0   : > { %505 = vrot.lane.b32.xlu0 %v2666_v10, %s2373_s11  ;;  %v2840_v18 = vsel %vm478_vm6, %v1854_v61, %v1855_v59 }
  0xf1   : > { %507 = vrot.lane.b32.xlu1 %v2669_v11, %s2373_s11  ;;  %v2806_v49 = vpop.permute.xlu1 %1862  ;;  %v2824_v58 = vsel %vm447_vm5, %v1845_v41, %v1849_v45  ;;  %v2849_v22 = vsel %vm447_vm5, %v1850_v2, %v1844_v42  ;;  %s259_s11 = scalar_lea.vmem %s3424_s2, %s1487_s5 }
  0xf2   : > { %v1858_v53 = vpop.permute.xlu0 %1857  ;;  %v1864_v3 = vunpack.i.l.bf16 %v2806_v49  ;;  %v1865_v5 = vunpack.i.h.bf16 %v2806_v49  ;;  %v2086_v7 = vpack.i.bf16 %v2824_v58, %v2821_v56 }
  0xf3   : > { %v1859_v62 = vunpack.i.l.bf16 %v1858_v53  ;;  %v1860_v24 = vunpack.i.h.bf16 %v1858_v53 }
  0xf4   : > { %2072 = vrot.lane.b32.xlu0 %v2071_v54, %s2382_s29  ;;  %v2852_v23 = vsel %vm447_vm5, %v1849_v45, %v1864_v3  ;;  %v2858_v29 = vsel %vm447_vm5, %v1864_v3, %v1865_v5 }
  0xf5   : > { %2077 = vrot.lane.b32.xlu1 %v2076_v0, %s2382_s29  ;;  %v496_v6 = vpop.permute.xlu1 %495  ;;  %v2843_v19 = vsel %vm478_vm6, %v1855_v59, %v1859_v62  ;;  %v2096_v34 = vpack.i.bf16 %v2852_v23, %v2849_v22  ;;  %v2878_v39 = vsel %vm478_vm6, %v1860_v24, %v1854_v61 }
  0xf6   : > { %v2833_v9 = vpop.permute.xlu0 %1867  ;;  %v2091_v20 = vpack.i.bf16 %v2843_v19, %v2840_v18  ;;  %v2101_v43 = vpack.i.bf16 %v2878_v39, %v2858_v29 }
  0xf7   : > { %v1870_v15 = vunpack.i.h.bf16 %v2833_v9  ;;  %v1869_v16 = vunpack.i.l.bf16 %v2833_v9 }
  0xf8   : > { %2082 = vrot.lane.b32.xlu0 %v2081_v14, %s2382_s29 }
  0xf9   : > { %2087 = vrot.lane.b32.xlu1 %v2086_v7, %s2382_s29  ;;  %v500_v25 = vpop.permute.xlu1 %499  ;;  %v2863_v30 = vsel %vm478_vm6, %v1869_v16, %v1870_v15  ;;  %v2871_v36 = vsel %vm478_vm6, %v1859_v62, %v1869_v16 }
  0xfa   : > { %v498_v32 = vpop.permute.xlu0 %497  ;;  %v2106_v41 = vpack.i.bf16 %v2863_v30, %v2871_v36 }
  0xfb   : > { %v2893_v53 = vsel %vm509_vm8, %v498_v32, %v500_v25  ;;  %v511_v54 = vsel %vm509_vm8, %v496_v6, %v498_v32 }
  0xfc   : > { %2092 = vrot.lane.b32.xlu0 %v2091_v20, %s2382_s29 }
  0xfd   : > { %2097 = vrot.lane.b32.xlu1 %v2096_v34, %s2382_s29  ;;  %v502_v38 = vpop.permute.xlu1 %501 }
  0xfe   : > { %v494_v42 = vpop.permute.xlu0 %493  ;;  %v513_v24 = vsel %vm509_vm8, %v500_v25, %v502_v38 }
  0xff   : > { %v510_v16 = vsel %vm509_vm8, %v494_v42, %v496_v6 }
 0x100   : > { %2102 = vrot.lane.b32.xlu0 %v2101_v43, %s2382_s29 }
 0x101   : > { %2107 = vrot.lane.b32.xlu1 %v2106_v41, %s2382_s29  ;;  %v1873_v45 = vpop.permute.xlu1 %1872 }
 0x102   : > { %v1875_v46 = vunpack.i.h.bf16 %v1873_v45  ;;  %v1874_v47 = vunpack.i.l.bf16 %v1873_v45  ;;  %v2890_v50 = vpop.permute.xlu0 %503 }
 0x104   : > { %895 = vrot.lane.b32.xlu0 %v511_v54, %s2382_s29  ;;  %v387_v59 = vsel %vm385_vm9, %v1874_v47, %v1875_v46 }
 0x105   : > { %897 = vrot.lane.b32.xlu1 %v2893_v53, %s2382_s29  ;;  %v2900_v61 = vpop.permute.xlu1 %1882  ;;  %v1505_v62 = vpack.c.bf16 %v2781_v26, %v387_v59 }
 0x106   : > { %v3437_v0 = vunpack.i.h.bf16 %v2900_v61  ;;  %v1884_v2 = vunpack.i.l.bf16 %v2900_v61  ;;  %v1878_v3 = vpop.permute.xlu0 %1877 }
 0x107   : > { %v1880_v7 = vunpack.i.h.bf16 %v1878_v3  ;;  %v1879_v14 = vunpack.i.l.bf16 %v1878_v3  ;;  %1506 = vmatprep.subr.bf16.mxu0 %v1505_v62  ;;  %v2923_v3 = vsel %vm509_vm8, %v502_v38, %v2890_v50 }
 0x108   : > { %v2909_v20 = vsel %vm385_vm9, %v1884_v2, %v3437_v0  ;;  %893 = vrot.lane.b32.xlu0 %v510_v16, %s2382_s29 }
 0x109   : > { %899 = vrot.lane.b32.xlu1 %v513_v24, %s2382_s29  ;;  %v1893_v32 = vpop.permute.xlu1 %1892  ;;  %v386_v34 = vsel %vm385_vm9, %v1879_v14, %v1874_v47  ;;  %v389_v41 = vsel %vm385_vm9, %v1880_v7, %v1884_v2  ;;  %v388_v6 = vsel %vm385_vm9, %v1875_v46, %v1880_v7  ;;  %v1509_v46 = vpack.c.bf16 %v2840_v18, %v2821_v56 }
 0x10a   : > { %v1894_v42 = vunpack.i.l.bf16 %v1893_v32  ;;  %v1888_v43 = vpop.permute.xlu0 %1887  ;;  %v1507_v45 = vpack.c.bf16 %v2810_v51, %v386_v34  ;;  %v1553_v59 = vpack.c.bf16 %v2813_v52, %v389_v41  ;;  %v1555_v33 = vpack.c.bf16 %v2784_v28, %v388_v6 }
 0x10b   : > { %v1890_v25 = vunpack.i.h.bf16 %v1888_v43  ;;  %v1889_v62 = vunpack.i.l.bf16 %v1888_v43  ;;  %v1895_v47 = vunpack.i.h.bf16 %v1893_v32  ;;  %v1557_v52 = vpack.c.bf16 %v2871_v36, %v2852_v23 }
 0x10c   : > { %1508 = vmatpush1.bf16.msra.mxu0 %v1507_v45  ;;  %901 = vrot.lane.b32.xlu0 %v2923_v3, %s2382_s29  ;;  %v1511_v2 = vpack.c.bf16 %v2878_v39, %v2849_v22 }
 0x10d   : > { %2112 = vrot.lane.b32.xlu1 %v2674_v12, %s2374_s19  ;;  %1554 = vmatprep.subr.bf16.mxu1 %v1553_v59  ;;  %v2932_v51 = vpop.permute.xlu1 %1902  ;;  %v542_v38 = vsel %vm540_vm10, %v1889_v62, %v1890_v25  ;;  %v541_v18 = vsel %vm540_vm10, %v1894_v42, %v1889_v62  ;;  %s1678_s19 = smul.u32 896, %s2354_s15  ;;  %s1339_s15 = scalar_lea.sflag [#allocation4], %s2555_s23 }
 0x10e   : > { %1510 = vmatprep.subr.bf16.mxu0 %v1509_v46  ;;  %1556 = vmatpush1.bf16.msra.mxu1 %v1555_v33  ;;  %v2937_v28 = vpop.permute.xlu0 %1897  ;;  %v1513_v56 = vpack.c.bf16 %v542_v38, %v511_v54  ;;  %v1905_v7 = vunpack.i.h.bf16 %v2932_v51  ;;  %v1904_v14 = vunpack.i.l.bf16 %v2932_v51  ;;  %v1559_v33 = vpack.c.bf16 %v2843_v19, %v2824_v58 }
 0x10f   : > { %v3436_v32 = vunpack.i.h.bf16 %v2937_v28  ;;  %v1899_v23 = vunpack.i.l.bf16 %v2937_v28  ;;  %1558 = vmatprep.subr.bf16.mxu1 %v1557_v52  ;;  %v543_v54 = vsel %vm540_vm10, %v1890_v25, %v1895_v47  ;;  %v1515_v41 = vpack.c.bf16 %v541_v18, %v510_v16 }
 0x110   : > { %1512 = vmatpush1.bf16.msra.mxu0 %v1511_v2  ;;  %2117 = vrot.lane.b32.xlu0 %v2674_v12, %s2375_s21  ;;  %v573_v45 = vsel %vm571_vm11, %v1904_v14, %v1905_v7  ;;  %v1563_v59 = vpack.c.bf16 %v543_v54, %v2893_v53  ;;  %v2967_v25 = vpack.i.bf16 %v2666_v10, %v2577_v1 }
 0x111   : > { %v2953_v22 = vsel %vm540_vm10, %v1899_v23, %v3436_v32  ;;  %2122 = vrot.lane.b32.xlu1 %v2674_v12, %s2376_s8  ;;  %1514 = vmatprep.subr.bf16.mxu0 %v1513_v56  ;;  %v1913_v36 = vpop.permute.xlu1 %1912  ;;  %v544_v39 = vsel %vm540_vm10, %v1895_v47, %v1899_v23 }
 0x112   : > { %1560 = vmatpush1.bf16.msra.mxu1 %v1559_v33  ;;  %v1914_v58 = vunpack.i.l.bf16 %v1913_v36  ;;  %v1908_v19 = vpop.permute.xlu0 %1907  ;;  %v1561_v6 = vpack.c.bf16 %v544_v39, %v513_v24  ;;  %v1915_v1 = vunpack.i.h.bf16 %v1913_v36 }
 0x113   : > { %v1910_v42 = vunpack.i.h.bf16 %v1908_v19  ;;  %v1909_v43 = vunpack.i.l.bf16 %v1908_v19 }
 0x114   : > { %1516 = vmatpush1.bf16.msra.mxu0 %v1515_v41  ;;  %2127 = vrot.lane.b32.xlu0 %v2674_v12, %s3452_s6  ;;  %v572_v51 = vsel %vm571_vm11, %v1914_v58, %v1904_v14  ;;  %v574_v54 = vsel %vm571_vm11, %v1905_v7, %v1915_v1 }
 0x115   : > { %2132 = vrot.lane.b32.xlu1 %v2674_v12, %s2379_s7  ;;  %1562 = vmatprep.subr.bf16.mxu1 %v1561_v6  ;;  %v1923_v16 = vpop.permute.xlu1 %1922  ;;  %v604_v24 = vsel %vm602_vm12, %v1909_v43, %v1910_v42 }
 0x116   : > { %1564 = vmatpush1.bf16.msra.mxu1 %v1563_v59  ;;  %v1924_v62 = vunpack.i.l.bf16 %v1923_v16  ;;  %v2972_v46 = vpop.permute.xlu0 %1917  ;;  %v1517_v47 = vpack.c.bf16 %v604_v24, %v573_v45  ;;  %v1925_v10 = vunpack.i.h.bf16 %v1923_v16 }
 0x117   : > { %v3431_v53 = vunpack.i.h.bf16 %v2972_v46  ;;  %v1919_v52 = vunpack.i.l.bf16 %v2972_v46 }
 0x118   : > { %2137 = vrot.lane.b32.xlu0 %v2967_v25, %s2378_s9  ;;  %1518 = vmatprep.subr.bf16.mxu0 %v1517_v47  ;;  %v603_v12 = vsel %vm602_vm12, %v1924_v62, %v1909_v43  ;;  %v605_v58 = vsel %vm602_vm12, %v1910_v42, %v1925_v10 }
 0x119   : > { %v2983_v38 = vsel %vm571_vm11, %v1919_v52, %v3431_v53  ;;  %662 = vrot.lane.b32.xlu1 %v2669_v11, %s2378_s9  ;;  %v1933_v2 = vpop.permute.xlu1 %1932  ;;  %v1519_v56 = vpack.c.bf16 %v603_v12, %v572_v51  ;;  %v575_v33 = vsel %vm571_vm11, %v1915_v1, %v1919_v52  ;;  %v1567_v62 = vpack.c.bf16 %v605_v58, %v574_v54  ;;  %s3373_s9 = scalar_lea.hbm %s3425_s3, %s1678_s19 }
 0x11a   : > { %v2987_v18 = vpop.permute.xlu0 %1927  ;;  %v1935_v36 = vunpack.i.h.bf16 %v1933_v2  ;;  %v1934_v39 = vunpack.i.l.bf16 %v1933_v2 }
 0x11b   : > { %v3430_v14 = vunpack.i.h.bf16 %v2987_v18  ;;  %v1929_v23 = vunpack.i.l.bf16 %v2987_v18  ;;  %1520 = vmatpush1.bf16.msra.mxu0 %v1519_v56 }
 0x11c   : > { %2142 = vrot.lane.b32.xlu0 %v2967_v25, %s2381_s10  ;;  %v3011_v47 = vsel %vm292_vm0, %v1780_v17, %v1934_v39  ;;  %v3014_v51 = vsel %vm292_vm0, %v1934_v39, %v1935_v36  ;;  %v2161_v39 = vpack.i.bf16 %v1935_v36, %v2669_v11  ;;  %vm726_vm0 = vcmask 556032  }
 0x11d   : > { %v2999_v19 = vsel %vm602_vm12, %v1929_v23, %v3430_v14  ;;  %2147 = vrot.lane.b32.xlu1 %v2967_v25, %s2380_s24  ;;  %v1943_v41 = vpop.permute.xlu1 %1942  ;;  %v606_v6 = vsel %vm602_vm12, %v1925_v10, %v1929_v23 }
 0x11e   : > { %v1945_v45 = vunpack.i.h.bf16 %v1943_v41  ;;  %v1944_v7 = vunpack.i.l.bf16 %v1943_v41  ;;  %v1938_v59 = vpop.permute.xlu0 %1937  ;;  %v1565_v42 = vpack.c.bf16 %v606_v6, %v575_v33  ;;  %v2156_v33 = vpack.i.bf16 %v3014_v51, %v3011_v47 }
 0x11f   : > { %v1940_v16 = vunpack.i.h.bf16 %v1938_v59  ;;  %v1939_v24 = vunpack.i.l.bf16 %v1938_v59 }
 0x120   : > { %693 = vrot.lane.b32.xlu0 %v2669_v11, %s2381_s10  ;;  %1566 = vmatprep.subr.bf16.mxu1 %v1565_v42  ;;  %v666_v52 = vsel %vm664_vm14, %v1944_v7, %v1945_v45 }
 0x121   : > { %724 = vrot.lane.b32.xlu1 %v2669_v11, %s2380_s24  ;;  %1568 = vmatpush1.bf16.msra.mxu1 %v1567_v62  ;;  %v3019_v1 = vpop.permute.xlu1 %1952  ;;  %v635_v10 = vsel %vm633_vm13, %v1939_v24, %v1940_v16  ;;  %s2386_s24 = smov [#allocation7]  }
 0x122   : > { %v3429_v12 = vunpack.i.h.bf16 %v3019_v1  ;;  %v1954_v13 = vunpack.i.l.bf16 %v3019_v1  ;;  %v1948_v2 = vpop.permute.xlu0 %1947  ;;  %v1521_v17 = vpack.c.bf16 %v666_v52, %v635_v10 }
 0x123   : > { %v1950_v56 = vunpack.i.h.bf16 %v1948_v2  ;;  %v1949_v23 = vunpack.i.l.bf16 %v1948_v2 }
 0x124   : > { %v3030_v54 = vsel %vm633_vm13, %v1954_v13, %v3429_v12  ;;  %2152 = vrot.lane.b32.xlu0 %v2967_v25, %s2382_s29  ;;  %1522 = vmatprep.subr.bf16.mxu0 %v1521_v17 }
 0x125   : > { %2157 = vrot.lane.b32.xlu1 %v2156_v33, %s2382_s29  ;;  %v3035_v58 = vpop.permute.xlu1 %656  ;;  %v634_v42 = vsel %vm633_vm13, %v1949_v23, %v1939_v24  ;;  %v637_v11 = vsel %vm633_vm13, %v1950_v56, %v1954_v13  ;;  %v636_v36 = vsel %vm633_vm13, %v1940_v16, %v1950_v56 }
 0x126   : > { %v1958_v41 = vpop.permute.xlu0 %1957 }
 0x127   : > { %v1960_v6 = vunpack.i.h.bf16 %v1958_v41  ;;  %v1959_v59 = vunpack.i.l.bf16 %v1958_v41 }
 0x128   : > { %2162 = vrot.lane.b32.xlu0 %v2161_v39, %s2382_s29 }
 0x129   : > { %v1968_v62 = vpop.permute.xlu1 %1967  ;;  %v665_v52 = vsel %vm664_vm14, %v1959_v59, %v1944_v7  ;;  %v668_v25 = vsel %vm664_vm14, %v1960_v6, %v3035_v58  ;;  %v667_v10 = vsel %vm664_vm14, %v1945_v45, %v1960_v6 }
 0x12a   : > { %v1970_v2 = vunpack.i.h.bf16 %v1968_v62  ;;  %v1969_v17 = vunpack.i.l.bf16 %v1968_v62  ;;  %v1963_v33 = vpop.permute.xlu0 %1962  ;;  %v1523_v41 = vpack.c.bf16 %v665_v52, %v634_v42  ;;  %v1569_v43 = vpack.c.bf16 %v668_v25, %v637_v11 }
 0x12b   : > { %v1965_v24 = vunpack.i.h.bf16 %v1963_v33  ;;  %v1964_v23 = vunpack.i.l.bf16 %v1963_v33  ;;  %v1571_v13 = vpack.c.bf16 %v667_v10, %v636_v36 }
 0x12c   : > { %v3048_v16 = vsel %vm354_vm2, %v1810_v60, %v1969_v17  ;;  %v3051_v7 = vsel %vm354_vm2, %v1969_v17, %v1970_v2  ;;  %1524 = vmatpush1.bf16.msra.mxu0 %v1523_v41  ;;  %1570 = vmatprep.subr.bf16.mxu1 %v1569_v43 }
 0x12d   : > { %v2171_v45 = vpack.i.bf16 %v3051_v7, %v3048_v16  ;;  %v3058_v56 = vsel %vm323_vm1, %v1805_v48, %v1964_v23  ;;  %v3061_v39 = vsel %vm323_vm1, %v1964_v23, %v1965_v24  ;;  %1572 = vmatpush1.bf16.msra.mxu1 %v1571_v13  ;;  %v1978_v57 = vpop.permute.xlu1 %1977  ;;  %v2176_v36 = vpack.i.bf16 %v1970_v2, %v1965_v24 }
 0x12e   : > { %v2166_v43 = vpack.i.bf16 %v3061_v39, %v3058_v56  ;;  %v1980_v6 = vunpack.i.h.bf16 %v1978_v57  ;;  %v1979_v59 = vunpack.i.l.bf16 %v1978_v57  ;;  %v1973_v42 = vpop.permute.xlu0 %1972  ;;  %v1597_v48 = vpack.c.bf16 %v3048_v16, %v3058_v56 }
 0x12f   : > { %v1975_v11 = vunpack.i.h.bf16 %v1973_v42  ;;  %v1974_v44 = vunpack.i.l.bf16 %v1973_v42  ;;  %2172 = vrot.lane.b32.xlu0 %v2171_v45, %s2382_s29  ;;  %vm909_vm1 = vcmask 547840   ;;  %v3453_v16 = vunpack.i.h.bf16 %v2900_v61 }
 0x130   : > { %2167 = vrot.lane.b32.xlu1 %v2166_v43, %s2382_s29  ;;  %v728_v62 = vsel %vm726_vm0, %v1979_v59, %v1980_v6  ;;  %v3454_v61 = vpack.c.bf16 %v2818_v55, %v2909_v20  ;;  %v3457_v55 = vunpack.i.h.bf16 %v2972_v46 }
 0x131   : > { %v3072_v52 = vpop.permute.xlu1 %687  ;;  %v697_v25 = vsel %vm695_vm15, %v1974_v44, %v1975_v11 }
 0x132   : > { %v1983_v10 = vpop.permute.xlu0 %1982  ;;  %v1525_v17 = vpack.c.bf16 %v728_v62, %v697_v25 }
 0x133   : > { %v1985_v33 = vunpack.i.h.bf16 %v1983_v10  ;;  %v1984_v41 = vunpack.i.l.bf16 %v1983_v10 }
 0x134   : > { %2177 = vrot.lane.b32.xlu1 %v2176_v36, %s2382_s29  ;;  %1526 = vmatprep.subr.bf16.mxu0 %v1525_v17 }
 0x135   : > { %v3076_v23 = vpop.permute.xlu1 %718  ;;  %v696_v24 = vsel %vm695_vm15, %v1984_v41, %v1974_v44  ;;  %v699_v57 = vsel %vm695_vm15, %v1985_v33, %v3072_v52  ;;  %v698_v43 = vsel %vm695_vm15, %v1975_v11, %v1985_v33 }
 0x136   : > { %v1988_v13 = vpop.permute.xlu0 %1987 }
 0x137   : > { %v1990_v45 = vunpack.i.h.bf16 %v1988_v13  ;;  %v1989_v2 = vunpack.i.l.bf16 %v1988_v13 }
 0x139   : > { %v1998_v42 = vpop.permute.xlu1 %1997  ;;  %v727_v62 = vsel %vm726_vm0, %v1989_v2, %v1979_v59  ;;  %v730_v25 = vsel %vm726_vm0, %v1990_v45, %v3076_v23  ;;  %v729_v36 = vsel %vm726_vm0, %v1980_v6, %v1990_v45 }
 0x13a   : > { %v2000_v10 = vunpack.i.h.bf16 %v1998_v42  ;;  %v1999_v17 = vunpack.i.l.bf16 %v1998_v42  ;;  %v1993_v12 = vpop.permute.xlu0 %1992  ;;  %v1527_v34 = vpack.c.bf16 %v727_v62, %v696_v24  ;;  %v1573_v13 = vpack.c.bf16 %v730_v25, %v699_v57 }
 0x13b   : > { %v1995_v14 = vunpack.i.h.bf16 %v1993_v12  ;;  %v1994_v44 = vunpack.i.l.bf16 %v1993_v12  ;;  %v1575_v41 = vpack.c.bf16 %v729_v36, %v698_v43 }
 0x13c   : > { %v763_v11 = vsel %vm757_vm3, %v1840_v35, %v1999_v17  ;;  %v764_v33 = vsel %vm757_vm3, %v1999_v17, %v2000_v10  ;;  %1528 = vmatpush1.bf16.msra.mxu0 %v1527_v34  ;;  %1574 = vmatprep.subr.bf16.mxu1 %v1573_v13 }
 0x13d   : > { %v2181_v59 = vpack.i.bf16 %v764_v33, %v763_v11  ;;  %v3093_v6 = vsel %vm416_vm4, %v1835_v40, %v1994_v44  ;;  %v3096_v45 = vsel %vm416_vm4, %v1994_v44, %v1995_v14  ;;  %1576 = vmatpush1.bf16.msra.mxu1 %v1575_v41  ;;  %v2013_v12 = vpop.permute.xlu1 %2012  ;;  %v2191_v57 = vpack.i.bf16 %v1995_v14, %v2000_v10 }
 0x13e   : > { %v2186_v31 = vpack.i.bf16 %v3096_v45, %v3093_v6  ;;  %v2015_v2 = vunpack.i.h.bf16 %v2013_v12  ;;  %v2014_v35 = vunpack.i.l.bf16 %v2013_v12  ;;  %v2003_v24 = vpop.permute.xlu0 %2002 }
 0x13f   : > { %2182 = vrot.lane.b32.xlu0 %v2181_v59, %s2382_s29  ;;  %v2005_v49 = vunpack.i.h.bf16 %v2003_v24  ;;  %v2004_v25 = vunpack.i.l.bf16 %v2003_v24 }
 0x140   : > { %v3104_v21 = vsel %vm447_vm5, %v1865_v5, %v2014_v35  ;;  %v3107_v40 = vsel %vm447_vm5, %v2014_v35, %v2015_v2  ;;  %2187 = vrot.lane.b32.xlu1 %v2186_v31, %s2382_s29 }
 0x141   : > { %v2196_v34 = vpack.i.bf16 %v3107_v40, %v3104_v21  ;;  %v911_v12 = vsel %vm909_vm1, %v2004_v25, %v2005_v49 }
 0x142   : > { %v2008_v43 = vpop.permute.xlu0 %2007 }
 0x143   : > { %2192 = vrot.lane.b32.xlu0 %v2191_v57, %s2382_s29 }
 0x144   : > { %2197 = vrot.lane.b32.xlu1 %v2196_v34, %s2382_s29 }
 0x146   : > { %v2018_v14 = vpop.permute.xlu0 %2017 }
 0x147   : > { %v2020_v42 = vunpack.i.h.bf16 %v2018_v14  ;;  %v2019_v62 = vunpack.i.l.bf16 %v2018_v14 }
 0x149   : > { %v2206_v5 = vpack.i.bf16 %v2020_v42, %v2015_v2  ;;  %v3117_v36 = vsel %vm478_vm6, %v1870_v15, %v2019_v62  ;;  %v3120_v10 = vsel %vm478_vm6, %v2019_v62, %v2020_v42  ;;  %v2009_v15 = vunpack.i.l.bf16 %v2008_v43 }
 0x14a   : > { %v2201_v13 = vpack.i.bf16 %v3120_v10, %v3117_v36  ;;  %v2023_v44 = vpop.permute.xlu1 %2022  ;;  %v2010_v2 = vunpack.i.h.bf16 %v2008_v43  ;;  %v1605_v4 = vpack.c.bf16 %v3117_v36, %v3104_v21 }
 0x14b   : > { %v3126_v41 = vpop.permute.xlu0 %2032  ;;  %v2025_v11 = vunpack.i.h.bf16 %v2023_v44  ;;  %v2024_v33 = vunpack.i.l.bf16 %v2023_v44  ;;  %2207 = vrot.lane.b32.xlu1 %v2206_v5, %s2382_s29  ;;  %v910_v42 = vsel %vm909_vm1, %v2009_v15, %v2004_v25 }
 0x14c   : > { %v2034_v9 = vunpack.i.l.bf16 %v3126_v41  ;;  %2202 = vrot.lane.b32.xlu0 %v2201_v13, %s2382_s29  ;;  %v3433_v59 = vunpack.i.h.bf16 %v3126_v41 }
 0x14d   : > { %v918_v31 = vsel %vm909_vm1, %v2024_v33, %v2025_v11 }
 0x14e   : > { %v3134_v35 = vpop.permute.xlu1 %2027  ;;  %v1529_v24 = vpack.c.bf16 %v918_v31, %v911_v12  ;;  %v919_v14 = vsel %vm909_vm1, %v2025_v11, %v2034_v9  ;;  %v920_v43 = vsel %vm909_vm1, %v2034_v9, %v3433_v59  ;;  %v912_v31 = vsel %vm909_vm1, %v2005_v49, %v2010_v2 }
 0x14f   : > { %v2030_v57 = vunpack.i.h.bf16 %v3134_v35  ;;  %v3435_v34 = vunpack.i.l.bf16 %v3134_v35  ;;  %v1579_v53 = vpack.c.bf16 %v919_v14, %v912_v31 }
 0x150   : > { %1530 = vmatprep.subr.bf16.mxu0 %v1529_v24 }
 0x151   : > { %v917_v62 = vsel %vm909_vm1, %v2030_v57, %v2024_v33  ;;  %v913_v5 = vsel %vm909_vm1, %v2010_v2, %v3435_v34 }
 0x152   : > { %v2043_v13 = vpop.permute.xlu0 %2042  ;;  %v1531_v44 = vpack.c.bf16 %v917_v62, %v910_v42  ;;  %v1577_v12 = vpack.c.bf16 %v920_v43, %v913_v5 }
 0x153   : > { %v2045_v24 = vunpack.i.h.bf16 %v2043_v13  ;;  %v2044_v17 = vunpack.i.l.bf16 %v2043_v13  ;;  %v2038_v11 = vpop.permute.xlu1 %2037 }
 0x154   : > { %v2040_v25 = vunpack.i.h.bf16 %v2038_v11  ;;  %v2039_v15 = vunpack.i.l.bf16 %v2038_v11  ;;  %1532 = vmatpush1.bf16.msra.mxu0 %v1531_v44  ;;  %1578 = vmatprep.subr.bf16.mxu1 %v1577_v12 }
 0x155   : > { %1580 = vmatpush1.bf16.msra.mxu1 %v1579_v53  ;;  %v932_v33 = vsel %vm909_vm1, %v2044_v17, %v2045_v24 }
 0x156   : > { %v3149_v57 = vpop.permute.xlu0 %2052  ;;  %v925_v9 = vsel %vm909_vm1, %v2039_v15, %v2040_v25 }
 0x157   : > { %v2055_v42 = vunpack.i.h.bf16 %v3149_v57  ;;  %v2048_v62 = vpop.permute.xlu1 %2047  ;;  %v1533_v49 = vpack.c.bf16 %v932_v33, %v925_v9  ;;  %v3432_v5 = vunpack.i.l.bf16 %v3149_v57 }
 0x158   : > { %v2049_v2 = vunpack.i.l.bf16 %v2048_v62  ;;  %v2050_v14 = vunpack.i.h.bf16 %v2048_v62 }
 0x159   : > { %1534 = vmatprep.subr.bf16.mxu0 %v1533_v49  ;;  %v931_v43 = vsel %vm909_vm1, %v2055_v42, %v2044_v17  ;;  %v2383_v42 = vmov 0  }
 0x15a   : > { %v924_v53 = vsel %vm909_vm1, %v2049_v2, %v2039_v15  ;;  %v927_v11 = vsel %vm909_vm1, %v2050_v14, %v3432_v5  ;;  %v926_v15 = vsel %vm909_vm1, %v2040_v25, %v2050_v14  ;;  %2211 = vset.pattern.permute.xlu1 %v2383_v42  ;;  %2212 = vset.pattern.permute.xlu0 %v2383_v42 }
 0x15b   : > { %v3156_v13 = vpop.permute.xlu1 %2057  ;;  %v1535_v44 = vpack.c.bf16 %v931_v43, %v924_v53 }
 0x15c   : > { %v3434_v12 = vunpack.i.h.bf16 %v3156_v13  ;;  %v2059_v31 = vunpack.i.l.bf16 %v3156_v13 }
 0x15d   : > { %1536 = vmatpush1.bf16.msra.mxu0 %v1535_v44 }
 0x15e   : > { %v2063_v33 = vpop.permute.xlu0 %2062  ;;  %v934_v17 = vsel %vm909_vm1, %v2059_v31, %v3434_v12  ;;  %v933_v9 = vsel %vm909_vm1, %v2045_v24, %v2059_v31 }
 0x15f   : > { %v2065_v62 = vunpack.i.h.bf16 %v2063_v33  ;;  %v2064_v49 = vunpack.i.l.bf16 %v2063_v33  ;;  %v2068_v2 = vpop.permute.xlu1 %2067  ;;  %v1581_v43 = vpack.c.bf16 %v934_v17, %v927_v11  ;;  %v1583_v53 = vpack.c.bf16 %v933_v9, %v926_v15  ;;  %v1038_v17 = vld [vmem:[%s259_s11] sm:$0xff] }
 0x160   : > { %v2070_v44 = vunpack.i.h.bf16 %v2068_v2  ;;  %v2069_v5 = vunpack.i.l.bf16 %v2068_v2 }
 0x161   : > { %1582 = vmatprep.subr.bf16.mxu1 %v1581_v43  ;;  %v939_v59 = vsel %vm909_vm1, %v2064_v49, %v2065_v62 }
 0x162   : > { %1584 = vmatpush1.bf16.msra.mxu1 %v1583_v53  ;;  %v506_v12 = vpop.permute.xlu0 %505  ;;  %v946_v25 = vsel %vm909_vm1, %v2069_v5, %v2070_v44 }
 0x163   : > { %v3174_v24 = vsel %vm509_vm8, %v2890_v50, %v506_v12  ;;  %v508_v14 = vpop.permute.xlu1 %507  ;;  %v1537_v31 = vpack.c.bf16 %v946_v25, %v939_v59 }
 0x164   : > { %v3180_v11 = vsel %vm509_vm8, %v506_v12, %v508_v14  ;;  %903 = vrot.lane.b32.xlu0 %v3174_v24, %s2382_s29 }
 0x165   : > { %905 = vrot.lane.b32.xlu1 %v3180_v11, %s2382_s29  ;;  %1538 = vmatprep.subr.bf16.mxu0 %v1537_v31 }
 0x166   : > { %v2073_v33 = vpop.permute.xlu0 %2072 }
 0x167   : > { %v2074_v50 = vunpack.i.l.bf16 %v2073_v33  ;;  %v3186_v15 = vpop.permute.xlu1 %2077  ;;  %v2075_v59 = vunpack.i.h.bf16 %v2073_v33 }
 0x168   : > { %v2080_v9 = vunpack.i.h.bf16 %v3186_v15  ;;  %v3438_v42 = vunpack.i.l.bf16 %v3186_v15  ;;  %907 = vrot.lane.b32.xlu0 %v508_v14, %s2382_s29  ;;  %s2280_s29 = sshll.u32 %s2386_s24, 4  ;;  %s2281_s29 = int_to_ptr.vmem [resolvable:$false] %s2280_s29 }
 0x169   : > { %v938_v12 = vsel %vm909_vm1, %v2074_v50, %v2064_v49  ;;  %1041 = vperm.xlu1 %2211, %v1038_v17   ;;  %v940_v60 = vsel %vm909_vm1, %v2065_v62, %v2075_v59  ;;  %s2282_s6 = scalar_lea.vmem %s2281_s29, 1792 }
 0x16a   : > { %v3192_v2 = vpop.permute.xlu0 %2082  ;;  %v945_v43 = vsel %vm909_vm1, %v2080_v9, %v2069_v5  ;;  %v941_v33 = vsel %vm909_vm1, %v2075_v59, %v3438_v42 }
 0x16b   : > { %v3439_v53 = vunpack.i.h.bf16 %v3192_v2  ;;  %v2084_v25 = vunpack.i.l.bf16 %v3192_v2  ;;  %v2088_v31 = vpop.permute.xlu1 %2087  ;;  %v1539_v34 = vpack.c.bf16 %v945_v43, %v938_v12 }
 0x16c   : > { %v2090_v14 = vunpack.i.h.bf16 %v2088_v31  ;;  %v2089_v32 = vunpack.i.l.bf16 %v2088_v31 }
 0x16d   : > { %1540 = vmatpush1.bf16.msra.mxu0 %v1539_v34  ;;  %v948_v49 = vsel %vm909_vm1, %v2084_v25, %v3439_v53  ;;  %v947_v5 = vsel %vm909_vm1, %v2070_v44, %v2084_v25 }
 0x16e   : > { %v2093_v17 = vpop.permute.xlu0 %2092  ;;  %v1585_v50 = vpack.c.bf16 %v948_v49, %v941_v33  ;;  %v1587_v9 = vpack.c.bf16 %v947_v5, %v940_v60  ;;  %v953_v62 = vsel %vm909_vm1, %v2089_v32, %v2090_v14 }
 0x16f   : > { %v2095_v26 = vunpack.i.h.bf16 %v2093_v17  ;;  %v2094_v12 = vunpack.i.l.bf16 %v2093_v17  ;;  %v2098_v43 = vpop.permute.xlu1 %2097 }
 0x170   : > { %1586 = vmatprep.subr.bf16.mxu1 %v1585_v50  ;;  %v2099_v0 = vunpack.i.l.bf16 %v2098_v43  ;;  %v2100_v34 = vunpack.i.h.bf16 %v2098_v43 }
 0x171   : > { %1588 = vmatpush1.bf16.msra.mxu1 %v1587_v9  ;;  %v960_v59 = vsel %vm909_vm1, %v2094_v12, %v2095_v26 }
 0x172   : > { %v3207_v31 = vpop.permute.xlu0 %2102  ;;  %v1541_v42 = vpack.c.bf16 %v960_v59, %v953_v62  ;;  %v952_v49 = vsel %vm909_vm1, %v2099_v0, %v2089_v32  ;;  %v954_v62 = vsel %vm909_vm1, %v2090_v14, %v2100_v34 }
 0x173   : > { %v2105_v53 = vunpack.i.h.bf16 %v3207_v31  ;;  %v3441_v44 = vunpack.i.l.bf16 %v3207_v31  ;;  %v3211_v25 = vpop.permute.xlu1 %2107 }
 0x174   : > { %v3440_v60 = vunpack.i.h.bf16 %v3211_v25  ;;  %v2109_v33 = vunpack.i.l.bf16 %v3211_v25  ;;  %1542 = vmatprep.subr.bf16.mxu0 %v1541_v42 }
 0x175   : > { %v959_v5 = vsel %vm909_vm1, %v2105_v53, %v2094_v12  ;;  %v955_v17 = vsel %vm909_vm1, %v2100_v34, %v3441_v44  ;;  %v2213_v44 = vld [vmem:[%s2559_s30 + $0x28] sm:$0xff] }
 0x176   : > { %v896_v50 = vpop.permute.xlu0 %895  ;;  %v1543_v9 = vpack.c.bf16 %v959_v5, %v952_v49  ;;  %v962_v43 = vsel %vm909_vm1, %v2109_v33, %v3440_v60  ;;  %v961_v42 = vsel %vm909_vm1, %v2095_v26, %v2109_v33  ;;  %v3227_v49 = vld [vmem:[%s2567_s22] sm:$0xff]  ;;  %v1593_v14 = vpack.c.bf16 %v3011_v47, %v2213_v44 }
 0x177   : > { %v898_v0 = vpop.permute.xlu1 %897  ;;  %v1589_v32 = vpack.c.bf16 %v962_v43, %v955_v17  ;;  %v1591_v53 = vpack.c.bf16 %v961_v42, %v954_v62  ;;  %v2214_v26 = vld [vmem:[%s2559_s30 + $0x20] sm:$0xff]  ;;  %v2384_v43 = vmov 0.0|0.0  }
 0x178   : > { %1544 = vmatpush1.bf16.msra.mxu0 %v1543_v9  ;;  %v967_v12 = vsel %vm909_vm1, %v896_v50, %v898_v0  ;;  %v1595_v34 = vpack.c.bf16 %v2726_v27, %v2214_v26 }
 0x179   : > { %1590 = vmatprep.subr.bf16.mxu1 %v1589_v32  ;;  %1096 = vmatprep.subr.mxu0 %v967_v12  ;;  %v3456_v12 = vpack.c.bf16 %v3051_v7, %v3061_v39 }
 0x17a   : > { %1592 = vmatpush1.bf16.msra.mxu1 %v1591_v53  ;;  %v894_v59 = vpop.permute.xlu0 %893 }
 0x17b   : > { %v900_v5 = vpop.permute.xlu1 %899  ;;  %v966_v60 = vsel %vm909_vm1, %v894_v59, %v896_v50 }
 0x17c   : > { %1097 = vmatpush1.msra.mxu0 %v966_v60  ;;  %v968_v27 = vsel %vm909_vm1, %v898_v0, %v900_v5  ;;  %v2215_v60 = vld [vmem:[%s2559_s30 + $0x30] sm:$0xff]  ;;  %s1677_s30 = smul.u32 56, %s2555_s23 }
 0x17d   : > { %1594 = vmatprep.subr.bf16.mxu0 %v1593_v14  ;;  %1113 = vmatmul.mubr.f32.vlgmr.msra.gmra.mrb[0].mxu0 %v3227_v49  ;;  %v1642_v50 = vpack.c.bf16 %v3014_v51, %v2215_v60  ;;  %v3455_v51 = vunpack.i.h.bf16 %v2937_v28  ;;  %v3458_v28 = vunpack.i.h.bf16 %v2987_v18  ;;  %v3459_v14 = vpack.c.bf16 %v2863_v30, %v2858_v29 }
 0x17e   : > { %v3235_v33 = vpop.permute.xlu0 %901  ;;  %1596 = vmatpush1.bf16.msra.mxu0 %v1595_v34  ;;  %1490 = vmatprep.mubr.msk.f32.mxu0 %vm1044_vm7, %v2874_v37  ;;  %s255_s22 = scalar_lea.vmem [#allocation7], %s1677_s30 }
 0x17f   : > { %v2113_v17 = vpop.permute.xlu1 %2112  ;;  %1598 = vmatprep.subr.bf16.mxu0 %v1597_v48  ;;  %v969_v47 = vsel %vm909_vm1, %v900_v5, %v3235_v33  ;;  %s1355_s21 = sshll.u32 %s255_s22, 4  ;;  %s3375_s21 = int_to_ptr.vmem [resolvable:$true] %s1355_s21 }
 0x180   : > { %v2114_v44 = vunpack.i.l.bf16 %v2113_v17  ;;  %1167 = vmatprep.subr.mxu1 %v969_v47  ;;  %v2115_v48 = vunpack.i.h.bf16 %v2113_v17  ;;  %s2276_s7 = scalar_lea.vmem %s3375_s21, 896  ;;  %p2283_p12 = scmp.lt.s32.totalorder %s3375_s21, %s2281_s29 }
 0x181   : > { %1168 = vmatpush1.msra.mxu1 %v968_v27  ;;  %p2277_p5 = scmp.ne.s32.totalorder %s3375_s21, %s2276_s7  ;;  %p2284_p1 = scmp.lt.s32.totalorder %s2282_s6, %s2276_s7 }
 0x182   : > { %v2118_v9 = vpop.permute.xlu0 %2117  ;;  %1600 = vmatpush1.bf16.msra.mxu0 %v1599_v8  ;;  %1641 = vmatprep.subr.bf16.mxu1 %v2384_v43  ;;  %v391_v56 = vsel %vm385_vm9, %v3453_v16, %v2114_v44  ;;  %v392_v32 = vsel %vm385_vm9, %v2114_v44, %v2115_v48  ;;  %v3461_v48 = vpack.c.bf16 %v3120_v10, %v3107_v40 }
 0x183   : > { %v2119_v62 = vunpack.i.l.bf16 %v2118_v9  ;;  %v2123_v42 = vpop.permute.xlu1 %2122  ;;  %1184 = vmatmul.mubr.f32.vlgmr.msra.gmra.mrb[0].mxu1 %v3227_v49  ;;  %v1601_v0 = vpack.c.bf16 %v3093_v6, %v391_v56  ;;  %v1648_v59 = vpack.c.bf16 %v3096_v45, %v392_v32  ;;  %v2120_v39 = vunpack.i.h.bf16 %v2118_v9  ;;  %p2278_p4 = pnand %p2277_p5, %p3472_p7  ;;  %p2285_p2 = por %p2284_p1, %p2283_p12 }
 0x184   : > { %1643 = vmatpush1.bf16.msra.mxu1 %v1642_v50  ;;  %1491 = vmatprep.mubr.msk.f32.mxu1 %vm1044_vm7, %v2874_v37  ;;  %v2124_v63 = vunpack.i.l.bf16 %v2123_v42  ;;  %v2125_v26 = vunpack.i.h.bf16 %v2123_v42  ;;  %v3460_v45 = vpack.c.bf16 %v2953_v22, %v2923_v3  ;;  %v3462_v3 = vunpack.i.h.bf16 %v3019_v1 }
 0x185   : > { %1602 = vmatprep.subr.bf16.mxu0 %v1601_v0  ;;  %1644 = vmatprep.subr.bf16.mxu1 %v2384_v43  ;;  %v546_v6 = vsel %vm540_vm10, %v3455_v51, %v2119_v62  ;;  %v547_v30 = vsel %vm540_vm10, %v2119_v62, %v2120_v39  ;;  %v3463_v40 = vpack.c.bf16 %v2999_v19, %v2983_v38  ;;  %p2279_p10 = pneg %p2278_p4 }
 0x186   : > { %v2128_v8 = vpop.permute.xlu0 %2127  ;;  %1604 = vmatpush1.bf16.msra.mxu0 %v3454_v61  ;;  %v1609_v21 = vpack.c.bf16 %v546_v6, %v3174_v24  ;;  %v577_v20 = vsel %vm571_vm11, %v3457_v55, %v2124_v63  ;;  %v578_v44 = vsel %vm571_vm11, %v2124_v63, %v2125_v26 }
 0x187   : > { %v2129_v53 = vunpack.i.l.bf16 %v2128_v8  ;;  %v2133_v37 = vpop.permute.xlu1 %2132  ;;  %1606 = vmatprep.subr.bf16.mxu0 %v1605_v4  ;;  %v2130_v47 = vunpack.i.h.bf16 %v2128_v8  ;;  %v1654_v4 = vpack.c.bf16 %v547_v30, %v3180_v11  ;;  %p2286_p9 = pnand %p2285_p2, %p2279_p10 }
 0x188   : > { %1646 = vmatpush1.bf16.msra.mxu1 %v3456_v12  ;;  %v2134_v46 = vunpack.i.l.bf16 %v2133_v37  ;;  %v2135_v9 = vunpack.i.h.bf16 %v2133_v37 }
 0x189   : > { %1647 = vmatprep.subr.bf16.mxu1 %v2384_v43  ;;  %v608_v36 = vsel %vm602_vm12, %v3458_v28, %v2129_v53  ;;  %v609_v42 = vsel %vm602_vm12, %v2129_v53, %v2130_v47 }
 0x18a   : > { %v2138_v5 = vpop.permute.xlu0 %2137  ;;  %1608 = vmatpush1.bf16.msra.mxu0 %v3459_v14  ;;  %v1613_v7 = vpack.c.bf16 %v608_v36, %v577_v20  ;;  %v639_v22 = vsel %vm633_vm13, %v3462_v3, %v2134_v46  ;;  %v1657_v51 = vpack.c.bf16 %v609_v42, %v578_v44  ;;  %v640_v6 = vsel %vm633_vm13, %v2134_v46, %v2135_v9 }
 0x18b   : > { %v2140_v34 = vunpack.i.h.bf16 %v2138_v5  ;;  %v2139_v24 = vunpack.i.l.bf16 %v2138_v5  ;;  %v663_v17 = vpop.permute.xlu1 %662  ;;  %1610 = vmatprep.subr.bf16.mxu0 %v1609_v21  ;;  %v3464_v36 = vunpack.i.l.bf16 %v3134_v35  ;;  %v3465_v5 = vunpack.i.h.bf16 %v3126_v41 }
 0x18c   : > { %1649 = vmatpush1.bf16.msra.mxu1 %v1648_v59 }
 0x18d   : > { %1650 = vmatprep.subr.bf16.mxu1 %v2384_v43  ;;  %v670_v29 = vsel %vm664_vm14, %v2139_v24, %v2140_v34  ;;  %v669_v62 = vsel %vm664_vm14, %v3035_v58, %v2139_v24  ;;  %v671_v32 = vsel %vm664_vm14, %v2140_v34, %v663_v17 }
 0x18e   : > { %v2143_v18 = vpop.permute.xlu0 %2142  ;;  %1612 = vmatpush1.bf16.msra.mxu0 %v3460_v45  ;;  %v1617_v0 = vpack.c.bf16 %v670_v29, %v639_v22  ;;  %v1619_v58 = vpack.c.bf16 %v669_v62, %v3030_v54  ;;  %v1660_v54 = vpack.c.bf16 %v671_v32, %v640_v6  ;;  %v3469_v32 = vunpack.i.h.bf16 %v3192_v2 }
 0x18f   : > { %v2145_v27 = vunpack.i.h.bf16 %v2143_v18  ;;  %v2144_v60 = vunpack.i.l.bf16 %v2143_v18  ;;  %v2148_v50 = vpop.permute.xlu1 %2147  ;;  %1614 = vmatprep.subr.bf16.mxu0 %v1613_v7 }
 0x190   : > { %v2150_v16 = vunpack.i.h.bf16 %v2148_v50  ;;  %v2149_v56 = vunpack.i.l.bf16 %v2148_v50  ;;  %1652 = vmatpush1.bf16.msra.mxu1 %v3461_v48 }
 0x191   : > { %1653 = vmatprep.subr.bf16.mxu1 %v2384_v43  ;;  %v701_v63 = vsel %vm695_vm15, %v2144_v60, %v2145_v27  ;;  %v700_v11 = vsel %vm695_vm15, %v3072_v52, %v2144_v60  ;;  %v3466_v60 = vunpack.i.h.bf16 %v3156_v13 }
 0x192   : > { %v694_v8 = vpop.permute.xlu0 %693  ;;  %1616 = vmatpush1.bf16.msra.mxu0 %v3463_v40  ;;  %v732_v1 = vsel %vm726_vm0, %v2149_v56, %v2150_v16  ;;  %v731_v38 = vsel %vm726_vm0, %v3076_v23, %v2149_v56 }
 0x193   : > { %v725_v10 = vpop.permute.xlu1 %724  ;;  %1618 = vmatprep.subr.bf16.mxu0 %v1617_v0  ;;  %v1621_v61 = vpack.c.bf16 %v732_v1, %v701_v63  ;;  %v1623_v21 = vpack.c.bf16 %v731_v38, %v700_v11  ;;  %v702_v28 = vsel %vm695_vm15, %v2145_v27, %v694_v8 }
 0x194   : > { %1655 = vmatpush1.bf16.msra.mxu1 %v1654_v4  ;;  %v733_v52 = vsel %vm726_vm0, %v2150_v16, %v725_v10  ;;  %v3467_v16 = vunpack.i.l.bf16 %v3149_v57 }
 0x195   : > { %1656 = vmatprep.subr.bf16.mxu1 %v2384_v43  ;;  %v1663_v17 = vpack.c.bf16 %v733_v52, %v702_v28 }
 0x196   : > { %v2153_v19 = vpop.permute.xlu0 %2152  ;;  %1620 = vmatpush1.bf16.msra.mxu0 %v1619_v58 }
 0x197   : > { %v2155_v53 = vunpack.i.h.bf16 %v2153_v19  ;;  %v2154_v37 = vunpack.i.l.bf16 %v2153_v19  ;;  %v2158_v12 = vpop.permute.xlu1 %2157  ;;  %1622 = vmatprep.subr.bf16.mxu0 %v1621_v61 }
 0x198   : > { %v2160_v55 = vunpack.i.h.bf16 %v2158_v12  ;;  %v2159_v20 = vunpack.i.l.bf16 %v2158_v12  ;;  %1658 = vmatpush1.bf16.msra.mxu1 %v1657_v51  ;;  %v3468_v51 = vunpack.i.l.bf16 %v3186_v15 }
 0x199   : > { %v914_v23 = vsel %vm909_vm1, %v3464_v36, %v2154_v37  ;;  %1659 = vmatprep.subr.bf16.mxu1 %v2384_v43  ;;  %v915_v59 = vsel %vm909_vm1, %v2154_v37, %v2155_v53 }
 0x19a   : > { %v921_v14 = vsel %vm909_vm1, %v3465_v5, %v2159_v20  ;;  %v2163_v7 = vpop.permute.xlu0 %2162  ;;  %1624 = vmatpush1.bf16.msra.mxu0 %v1623_v21  ;;  %v922_v39 = vsel %vm909_vm1, %v2159_v20, %v2160_v55 }
 0x19b   : > { %v2165_v26 = vunpack.i.h.bf16 %v2163_v7  ;;  %v2164_v34 = vunpack.i.l.bf16 %v2163_v7  ;;  %v1625_v24 = vpack.c.bf16 %v922_v39, %v915_v59  ;;  %v1627_v46 = vpack.c.bf16 %v921_v14, %v914_v23 }
 0x19c   : > { %1661 = vmatpush1.bf16.msra.mxu1 %v1660_v54  ;;  %v3470_v7 = vunpack.i.l.bf16 %v3207_v31  ;;  %v2385_v31 = vmov 0.0  }
 0x19d   : > { %1626 = vmatprep.subr.bf16.mxu0 %v1625_v24  ;;  %1662 = vmatprep.subr.bf16.mxu1 %v2384_v43  ;;  %v916_v35 = vsel %vm909_vm1, %v2155_v53, %v2164_v34  ;;  %v923_v41 = vsel %vm909_vm1, %v2160_v55, %v2165_v26  ;;  %v3471_v34 = vunpack.i.h.bf16 %v3211_v25 }
 0x19e   : > { %1628 = vmatpush1.bf16.msra.mxu0 %v1627_v46  ;;  %v1666_v18 = vpack.c.bf16 %v923_v41, %v916_v35 }
 0x1a0   : > { %1664 = vmatpush1.bf16.msra.mxu1 %v1663_v17 }
 0x1a1   : > { %v2173_v47 = vpop.permute.xlu0 %2172  ;;  %1665 = vmatprep.subr.bf16.mxu1 %v2384_v43 }
 0x1a2   : > { %v2175_v45 = vunpack.i.h.bf16 %v2173_v47  ;;  %v2174_v29 = vunpack.i.l.bf16 %v2173_v47  ;;  %v2168_v30 = vpop.permute.xlu1 %2167 }
 0x1a3   : > { %v2170_v44 = vunpack.i.h.bf16 %v2168_v30  ;;  %v2169_v27 = vunpack.i.l.bf16 %v2168_v30 }
 0x1a4   : > { %v935_v50 = vsel %vm909_vm1, %v3466_v60, %v2174_v29  ;;  %1667 = vmatpush1.bf16.msra.mxu1 %v1666_v18  ;;  %v936_v9 = vsel %vm909_vm1, %v2174_v29, %v2175_v45 }
 0x1a5   : > { %v928_v56 = vsel %vm909_vm1, %v3467_v16, %v2169_v27  ;;  %v929_v48 = vsel %vm909_vm1, %v2169_v27, %v2170_v44  ;;  %1668 = vmatprep.subr.bf16.mxu1 %v2384_v43 }
 0x1a6   : > { %v1631_v3 = vpack.c.bf16 %v935_v50, %v928_v56  ;;  %v2178_v22 = vpop.permute.xlu1 %2177  ;;  %v1629_v42 = vpack.c.bf16 %v936_v9, %v929_v48 }
 0x1a7   : > { %v2180_v62 = vunpack.i.h.bf16 %v2178_v22  ;;  %v2179_v0 = vunpack.i.l.bf16 %v2178_v22 }
 0x1a8   : > { %1630 = vmatprep.subr.bf16.mxu0 %v1629_v42 }
 0x1a9   : > { %v937_v13 = vsel %vm909_vm1, %v2175_v45, %v2180_v62  ;;  %v930_v63 = vsel %vm909_vm1, %v2170_v44, %v2179_v0  ;;  %1632 = vmatpush1.bf16.msra.mxu0 %v1631_v3 }
 0x1aa   : > { %v1669_v4 = vpack.c.bf16 %v937_v13, %v930_v63 }
 0x1ac   : > { %1670 = vmatpush1.bf16.msra.mxu1 %v1669_v4 }
 0x1ad   : > { %1671 = vmatprep.subr.bf16.mxu1 %v2384_v43 }
 0x1b1   : > { %v2183_v57 = vpop.permute.xlu0 %2182 }
 0x1b2   : > { %v2185_v8 = vunpack.i.h.bf16 %v2183_v57  ;;  %v2184_v40 = vunpack.i.l.bf16 %v2183_v57  ;;  %v2188_v1 = vpop.permute.xlu1 %2187 }
 0x1b3   : > { %v2190_v10 = vunpack.i.h.bf16 %v2188_v1  ;;  %v2189_v61 = vunpack.i.l.bf16 %v2188_v1 }
 0x1b4   : > { %v942_v58 = vsel %vm909_vm1, %v3468_v51, %v2184_v40  ;;  %v943_v6 = vsel %vm909_vm1, %v2184_v40, %v2185_v8 }
 0x1b5   : > { %v949_v11 = vsel %vm909_vm1, %v3469_v32, %v2189_v61  ;;  %v2193_v38 = vpop.permute.xlu0 %2192  ;;  %v950_v19 = vsel %vm909_vm1, %v2189_v61, %v2190_v10 }
 0x1b6   : > { %v1635_v53 = vpack.c.bf16 %v949_v11, %v942_v58  ;;  %v2195_v37 = vunpack.i.h.bf16 %v2193_v38  ;;  %v2194_v12 = vunpack.i.l.bf16 %v2193_v38  ;;  %v1633_v54 = vpack.c.bf16 %v950_v19, %v943_v6  ;;  %v2198_v20 = vpop.permute.xlu1 %2197 }
 0x1b7   : > { %v2199_v28 = vunpack.i.l.bf16 %v2198_v20  ;;  %v2200_v2 = vunpack.i.h.bf16 %v2198_v20 }
 0x1b8   : > { %v944_v21 = vsel %vm909_vm1, %v2185_v8, %v2194_v12  ;;  %v951_v55 = vsel %vm909_vm1, %v2190_v10, %v2195_v37  ;;  %1634 = vmatprep.subr.bf16.mxu0 %v1633_v54 }
 0x1b9   : > { %v1672_v15 = vpack.c.bf16 %v951_v55, %v944_v21  ;;  %1636 = vmatpush1.bf16.msra.mxu0 %v1635_v53  ;;  %v956_v39 = vsel %vm909_vm1, %v3470_v7, %v2199_v28 }
 0x1bb   : > { %1673 = vmatpush1.bf16.msra.mxu1 %v1672_v15 }
 0x1bc   : > { %1674 = vmatprep.subr.bf16.mxu1 %v2384_v43  ;;  %v957_v43 = vsel %vm909_vm1, %v2199_v28, %v2200_v2 }
 0x1bd   : > { %v2208_v52 = vpop.permute.xlu1 %2207 }
 0x1be   : > { %v2210_v36 = vunpack.i.h.bf16 %v2208_v52  ;;  %v2209_v23 = vunpack.i.l.bf16 %v2208_v52  ;;  %v2203_v59 = vpop.permute.xlu0 %2202 }
 0x1bf   : > { %v2205_v5 = vunpack.i.h.bf16 %v2203_v59  ;;  %v2204_v14 = vunpack.i.l.bf16 %v2203_v59 }
 0x1c0   : > { %v958_v26 = vsel %vm909_vm1, %v2200_v2, %v2209_v23 }
 0x1c1   : > { %v963_v24 = vsel %vm909_vm1, %v3471_v34, %v2204_v14  ;;  %v965_v17 = vsel %vm909_vm1, %v2205_v5, %v2210_v36  ;;  %v964_v46 = vsel %vm909_vm1, %v2204_v14, %v2205_v5 }
 0x1c2   : > { %v1639_v35 = vpack.c.bf16 %v963_v24, %v956_v39  ;;  %v1675_v41 = vpack.c.bf16 %v965_v17, %v958_v26  ;;  %v1637_v47 = vpack.c.bf16 %v964_v46, %v957_v43 }
 0x1c4   : > { %1638 = vmatprep.subr.bf16.mxu0 %v1637_v47  ;;  %1676 = vmatpush1.bf16.msra.mxu1 %v1675_v41 }
 0x1c5   : > { %1640 = vmatpush1.bf16.msra.mxu0 %v1639_v35  ;;  %1309 = vmatprep.subr.mxu1 %v2385_v31 }
 0x1d6   : > { %v904_v18 = vpop.permute.xlu0 %903 }
 0x1d7   : > { %v970_v25 = vsel %vm909_vm1, %v3235_v33, %v904_v18  ;;  %v906_v45 = vpop.permute.xlu1 %905 }
 0x1d8   : > { %v971_v29 = vsel %vm909_vm1, %v904_v18, %v906_v45 }
 0x1d9   : > { %1238 = vmatprep.subr.mxu0 %v971_v29 }
 0x1da   : > { %1239 = vmatpush1.msra.mxu0 %v970_v25  ;;  %v908_v30 = vpop.permute.xlu0 %907 }
 0x1db   : > { %v972_v44 = vsel %vm909_vm1, %v906_v45, %v908_v30  ;;  %1255 = vmatmul.mubr.f32.vlgmr.msra.gmra.mrb[2].mxu0 %v3227_v49 }
 0x1dc   : > { %1310 = vmatpush1.msra.mxu1 %v972_v44 }
 0x1dd   : > { %1326 = vmatmul.mubr.f32.vlgmr.msra.gmra.mrb[2].mxu1 %v3227_v49 }
 0x1e8   : > { %v1042_v27 = vpop.permute.xlu1 %1041 }
 0x250   : > { %v1114_v60 = vpop.f32.mrb[0].mxu0 }
 0x251   : > { %v1115_v50 = vadd.f32 %v1114_v60, %v1042_v27  ;;  %v1116_v9 = vpop.f32.mrb[1].mxu0 }
 0x252   : > { %v1117_v33 = vadd.f32 %v1116_v9, %v1042_v27 }
 0x253   : > { %1331 = vst [vmem:[%s255_s22] sm:$0xff] %v1115_v50 }
 0x254   : > { %1332 = vst [vmem:[%s255_s22 + $0x8] sm:$0xff] %v1117_v33 }
 0x256   : > { %v1185_v16 = vpop.f32.mrb[0].mxu1 }
 0x257   : > { %v1186_v56 = vadd.f32 %v1185_v16, %v1042_v27  ;;  %v1187_v48 = vpop.f32.mrb[1].mxu1 }
 0x258   : > { %v1188_v3 = vadd.f32 %v1187_v48, %v1042_v27 }
 0x259   : > { %1333 = vst [vmem:[%s255_s22 + $0x10] sm:$0xff] %v1186_v56 }
 0x25a   : > { %1334 = vst [vmem:[%s255_s22 + $0x18] sm:$0xff] %v1188_v3 }
 0x2ae   : > { %v1256_v22 = vpop.f32.mrb[2].mxu0 }
 0x2af   : > { %v1257_v49 = vadd.f32 %v1256_v22, %v1042_v27  ;;  %v1258_v42 = vpop.f32.mrb[3].mxu0 }
 0x2b0   : > { %v1259_v62 = vadd.f32 %v1258_v42, %v1042_v27  ;;  %v1327_v0 = vpop.f32.mrb[2].mxu1 }
 0x2b1   : > { %1335 = vst [vmem:[%s255_s22 + $0x20] sm:$0xff] %v1257_v49  ;;  %v1328_v13 = vadd.f32 %v1327_v0, %v1042_v27  ;;  %v1329_v63 = vpop.f32.mrb[3].mxu1 }
 0x2b2   : > { %1336 = vst [vmem:[%s255_s22 + $0x28] sm:$0xff] %v1259_v62 }
 0x2b3   : > { %1337 = vst [vmem:[%s255_s22 + $0x30] sm:$0xff] %v1328_v13 }
 0x2b4   : > { %2289 = shalt.err (!%p2286_p9)
}
 0x2b5   : > { %s2290_s23 = scalar_lea.hbm %s3373_s9, 896  ;;  %s2294_s18 = scalar_lea.hbm %s3425_s3, 1792 }
 0x2b6   : > { %p2291_p11 = scmp.ne.s32.totalorder %s3373_s9, %s2290_s23  ;;  %p2295_p13 = scmp.lt.u32.totalorder %s3373_s9, %s3425_s3 }
 0x2b7   : > { %p2296_p8 = scmp.lt.u32.totalorder %s2294_s18, %s2290_s23  ;;  %p2298_p5 = scmp.lt.u32.totalorder %s2290_s23, %s3373_s9 }
 0x2b8   : > { %p2292_p3 = pnand %p2291_p11, %p3472_p7 }
 0x2b9   : > { %p2297_p0 = por %p2296_p8, %p2295_p13 }
 0x2ba   : > { %p2293_p6 = pneg %p2292_p3 }
 0x2bb   : > { %p2299_p4 = por %p2298_p5, %p2297_p0 }
 0x2bd   : > { %p2300_p10 = pnand %p2299_p4, %p2293_p6 }
 0x2bf   : > { %2303 = shalt.err (!%p2300_p10)
}
 0x2c0   : > { %1683 = dma.vmem_to_hbm [thread:$0]  (%p3472_p7), %s3375_s21, 896, %s3373_s9, %s1339_s15  }
 0x2c1 PF: > { %s1367_s30 = sand.u32 1, %s2342_s12   ;;  %p3473_p12 = scmp.ne.s32.totalorder %s3445_s27, 0 }
 0x2c2   : > { %p3474_p1 = scmp.ge.s32.totalorder %s2362_s17, 2  ;;  %s1368_s22 = scalar_lea.sflag [#allocation4], %s1367_s30 }
 0x2c4   : > { %p1693_p2 = pnand %p3474_p1, %p3473_p12 }
 0x2c6   : > { %2337 = dma.done.wait (!%p1693_p2), %s1368_s22, 896  }
 0x2c7   : > { %2339 = vsyncadd (!%p1693_p2), %s1368_s22, 4294966400  ;;  %s22_s17 = sadd.s32 1, %s2362_s17   ;;  %s3475_s12 = smov %s2346_s13 }
 0x2c8   : > { %p19_p9 = scmp.ge.s32.totalorder %s22_s17, 4   ;;  %s3476_s13 = smov %s2350_s14 }
 0x2c9   : > { %s3477_s14 = smov %s2463_s26  ;;  %s3478_s15 = smov %s2358_s16 }
 0x2ca   : > { %s3479_s16 = smov %s3481_s20  ;;  %21 = sbr.rel (!%p19_p9) target bundleno = 8 (0x8), region = 93 }
 0x2d1   :  { %1373 = vsyncpa [#allocation3], 1 }
 0x2d2   :  { %1375 = vsyncpa [#allocation3 + $0x1], 1 }
 0x2d3   :  { %1376 = vsyncpa [#allocation6], 1 }
 0x2d4   :  { %1378 = vsyncpa [#allocation6 + $0x1], 1 }
 0x2d5   :  { %1379 = vsyncpa [#allocation4], 1 }
 0x2d6   :  { %1381 = vsyncpa [#allocation4 + $0x1], 1 }

</bundles_post_ra>
